<compile_context>
chip_gen: v5e
topology: v5e:2x2
jax: 0.10.0
libtpu: 0.0.40
codegen_flags: <defaults>
</compile_context>

<pallas_src>
import functools

import jax
import jax.numpy as jnp
from jax.experimental import pallas as pl
from jax.experimental.pallas import tpu as pltpu

NUM_RESIDUE_TYPES = 20   # stand-in for len(data.Protein.residue2id)
MAX_SEQ_DIST = 10        # GraphRewiring.max_seq_dist

# Packed input column layout (all f32; index values are small ints, exact in f32).
_COL_IN_RT, _COL_OUT_RT, _COL_REL, _COL_SD, _COL_DIST, _COL_VALID = range(6)
_N_PACKED_COLS = 8


def _round_up(x, m):
    return ((x + m - 1) // m) * m


def _pick_tile_e(e, f_pad, target=2048, vmem_budget=24 * 1024 * 1024):
    """Rows per grid step: large (output-BW-bound), 8-aligned, >=2 steps, VMEM-safe."""
    # Per row of the step: double-buffered input (lane-padded to 128 in VMEM)
    # + double-buffered output (f_pad lanes), all f32.
    bytes_per_row = 4 * (128 + f_pad) * 2
    cap_rows = max(8, (vmem_budget // bytes_per_row) // 8 * 8)
    half = _round_up(max(8, -(-e // 2)), 8)          # keep >= 2 grid steps
    return max(8, min(_round_up(target, 8), half, cap_rows))


def _make_edge_feature_kernel(num_relation: int):
    c1 = NUM_RESIDUE_TYPES
    c2 = 2 * NUM_RESIDUE_TYPES
    c3 = c2 + num_relation
    c4 = c3 + MAX_SEQ_DIST + 1      # column holding the spatial distance

    def kernel(packed_ref, out_ref):
        te, f_pad = out_ref.shape
        lane = jax.lax.broadcasted_iota(jnp.int32, (te, f_pad), 1)

        packed = packed_ref[...]                                          # (TE, 8) f32
        in_rt = packed[:, _COL_IN_RT:_COL_IN_RT + 1].astype(jnp.int32)    # (TE, 1)
        out_rt = packed[:, _COL_OUT_RT:_COL_OUT_RT + 1].astype(jnp.int32)
        rel = packed[:, _COL_REL:_COL_REL + 1].astype(jnp.int32)
        sd = jnp.minimum(packed[:, _COL_SD:_COL_SD + 1].astype(jnp.int32),
                         MAX_SEQ_DIST)                                    # .clamp(max=...)
        dist = packed[:, _COL_DIST:_COL_DIST + 1]                         # (TE, 1) f32
        valid = packed[:, _COL_VALID:_COL_VALID + 1]                      # (TE, 1) {0,1}

        # Four one-hot blocks collapsed into OR-ed compares + a single select.
        hits = ((lane == in_rt)
                | (lane == out_rt + c1)
                | (lane == rel + c2)
                | (lane == sd + c3))
        feat = jnp.where(lane == c4, dist, hits.astype(jnp.float32))
        # Fused valid mask: padded / invalid rows zeroed before the store.
        out_ref[...] = feat * valid

    return kernel


def edge_gearnet_features(in_rt, out_rt, rel, seq_dist, dist, valid, num_relation):
    """Pallas kernel wrapper: builds the (masked) GearNet edge feature matrix."""
    e = in_rt.shape[0]
    f = 2 * NUM_RESIDUE_TYPES + num_relation + (MAX_SEQ_DIST + 1) + 1
    f_pad = _round_up(f, 128)         # lane-dense output; never clips one-hot columns

    tile_e = _pick_tile_e(e, f_pad)
    e_pad = _round_up(e, tile_e)

    f32 = jnp.float32
    packed = jnp.stack([
        in_rt.astype(f32), out_rt.astype(f32), rel.astype(f32),
        seq_dist.astype(f32), dist.astype(f32), valid.astype(f32),
        jnp.zeros((e,), f32), jnp.zeros((e,), f32),
    ], axis=1)                                              # (E, 8)
    packed = jnp.pad(packed, ((0, e_pad - e), (0, 0)))      # padded rows: valid = 0

    feat = pl.pallas_call(
        _make_edge_feature_kernel(num_relation),
        out_shape=jax.ShapeDtypeStruct((e_pad, f_pad), jnp.float32),
        grid=(e_pad // tile_e,),
        in_specs=[pl.BlockSpec((tile_e, _N_PACKED_COLS), lambda i: (i, 0))],
        out_specs=pl.BlockSpec((tile_e, f_pad), lambda i: (i, 0)),
        compiler_params=pltpu.CompilerParams(
            dimension_semantics=("parallel",),
            vmem_limit_bytes=32 * 1024 * 1024),  # explicit: v5e defaults to 16 MiB
    )(packed)

    # TODO(synk): downstream GearNet layers could consume the lane-dense
    # (e_pad, f_pad) slab (optionally cast to bf16) directly; slice once here
    # only to match the torch module's (E, F) output contract.
    return feat[:e, :f]


def graph_rewiring_forward(attn_output, atom2residue, residue_type,
                           node_position, node2graph, num_nodes, *, num_relation):
    """JAX/Pallas port of GraphRewiring.forward with edge_feature='gearnet'.

    Returns the fields the rewired graph would be built from:
      edge_list (E_max, 3), edge_weight (E_max,), num_edges (G,), offsets (E_max,),
      edge_feature (E_max, F), valid (E_max,) mask for the padded edge slots.
    """
    n = attn_output.shape[0]
    e_max = attn_output.size
    num_graphs = num_nodes.shape[0]

    # --- adjacency_matrix_to_edge_list -------------------------------------
    # TODO(synk): torch.nonzero produces a dynamic-length result; emulated with
    # static padding to e_max and a `valid` mask.
    i_idx, j_idx = jnp.nonzero(attn_output, size=e_max, fill_value=0)
    num_valid = jnp.sum(attn_output != 0)
    valid = jnp.arange(e_max) < num_valid
    relation = j_idx // n
    node_out = j_idx % n
    edge_list = jnp.stack([i_idx, node_out, relation], axis=1)
    edge_weight = jnp.where(valid, attn_output[i_idx, j_idx], 0.0)

    # --- apply_edge_layer: sort edges by source graph ----------------------
    node_in = edge_list[:, 0]
    edge2graph = jnp.where(valid, node2graph[node_in], num_graphs)  # pads sort last
    order = jnp.argsort(edge2graph, stable=True)
    edge_list = edge_list[order]
    # NOTE: torch passes edge_weight unsorted to the graph ctor; we keep it
    # aligned with the sorted edge_list (coherent per-edge pairing).
    edge_weight = edge_weight[order]
    edge2graph = edge2graph[order]
    valid = valid[order]

    num_edges = jnp.bincount(edge2graph, length=num_graphs + 1)[:num_graphs]
    num_cum_nodes = jnp.cumsum(num_nodes)
    graph_offset = num_cum_nodes - num_nodes
    offsets = jnp.where(valid,
                        graph_offset[jnp.clip(edge2graph, 0, num_graphs - 1)], 0)

    # --- edge_gearnet: gathers in JAX, feature hot-path in Pallas ----------
    node_in = edge_list[:, 0]
    node_out = edge_list[:, 1]
    rel = edge_list[:, 2]
    residue_in = atom2residue[node_in]
    residue_out = atom2residue[node_out]
    in_rt = residue_type[residue_in]
    out_rt = residue_type[residue_out]
    seq_dist = jnp.abs(residue_in - residue_out)
    dpos = node_position[node_in] - node_position[node_out]
    dist = jnp.sqrt(jnp.sum(dpos * dpos, axis=-1))   # precomputed: no in-kernel reduce

    edge_feature = edge_gearnet_features(in_rt, out_rt, rel, seq_dist, dist,
                                         valid, num_relation)
    # NOTE: valid mask is applied inside the Pallas kernel (no extra XLA pass).

    return dict(edge_list=edge_list, edge_weight=edge_weight,
                num_edges=num_edges, offsets=offsets,
                edge_feature=edge_feature, valid=valid)


if __name__ == "__main__":
    key = jax.random.PRNGKey(0)
    n, r, num_graphs, nres = 16, 2, 2, 8

    k1, k2, k3 = jax.random.split(key, 3)
    u = jax.random.uniform(k1, (n, n * r), dtype=jnp.float32)
    attn_output = jnp.where(u > 0.7, u, 0.0)           # sparse attention adjacency
    atom2residue = jnp.arange(n, dtype=jnp.int32) // 2  # 2 atoms per residue
    residue_type = jax.random.randint(k2, (nres,), 0, NUM_RESIDUE_TYPES,
                                      dtype=jnp.int32)
    node_position = jax.random.normal(k3, (n, 3), dtype=jnp.float32)
    node2graph = jnp.arange(n, dtype=jnp.int32) // (n // num_graphs)
    num_nodes = jnp.full((num_graphs,), n // num_graphs, dtype=jnp.int32)

    fwd = jax.jit(functools.partial(graph_rewiring_forward, num_relation=r))
    out = fwd(attn_output, atom2residue, residue_type, node_position,
              node2graph, num_nodes)
    jax.block_until_ready(out)

    # Pure-JAX reference of the edge-feature hot path for a sanity check.
    el, valid = out["edge_list"], out["valid"]
    ni, no, rel = el[:, 0], el[:, 1], el[:, 2]
    res_in, res_out = atom2residue[ni], atom2residue[no]

    def oh(x, k):
        return (x[:, None] == jnp.arange(k)[None, :]).astype(jnp.float32)

    ref = jnp.concatenate([
        oh(residue_type[res_in], NUM_RESIDUE_TYPES),
        oh(residue_type[res_out], NUM_RESIDUE_TYPES),
        oh(rel, r),
        oh(jnp.minimum(jnp.abs(res_in - res_out), MAX_SEQ_DIST), MAX_SEQ_DIST + 1),
        jnp.linalg.norm(node_position[ni] - node_position[no], axis=-1,
                        keepdims=True),
    ], axis=-1) * valid[:, None]

    assert out["edge_feature"].shape == ref.shape
    assert jnp.allclose(out["edge_feature"], ref, atol=1e-5), "feature mismatch"
    print("KERNEL_OK")
</pallas_src>

<mosaic_0001>
module attributes {stable_mosaic.version = 11 : i64} {
  func.func @kernel(%arg0: i32, %arg1: memref<256x8xf32, #tpu.memory_space<vmem>>, %arg2: memref<256x128xf32, #tpu.memory_space<vmem>>) attributes {dimension_semantics = [#tpu.dimension_semantics<parallel>], iteration_bounds = array<i64: 2>, scalar_prefetch = 0 : i64, scratch_operands = 0 : i64, tpu.core_type = #tpu.core_type<tc>, window_params = [{transform_indices = @transform_0, window_bounds = array<i64: 256, 8>}, {transform_indices = @transform_1, window_bounds = array<i64: 256, 128>}]} {
    %0 = tpu.iota {dimensions = array<i32: 1>} : vector<256x128xi32>
    %c0 = arith.constant 0 : index
    %c0_0 = arith.constant 0 : index
    %1 = vector.load %arg1[%c0, %c0_0] : memref<256x8xf32, #tpu.memory_space<vmem>>, vector<256x8xf32>
    %2 = vector.extract_strided_slice %1 {offsets = [0, 0], sizes = [256, 1], strides = [1, 1]} : vector<256x8xf32> to vector<256x1xf32>
    %3 = arith.fptosi %2 : vector<256x1xf32> to vector<256x1xi32>
    %4 = vector.extract_strided_slice %1 {offsets = [0, 1], sizes = [256, 1], strides = [1, 1]} : vector<256x8xf32> to vector<256x1xf32>
    %5 = arith.fptosi %4 : vector<256x1xf32> to vector<256x1xi32>
    %6 = vector.extract_strided_slice %1 {offsets = [0, 2], sizes = [256, 1], strides = [1, 1]} : vector<256x8xf32> to vector<256x1xf32>
    %7 = arith.fptosi %6 : vector<256x1xf32> to vector<256x1xi32>
    %8 = vector.extract_strided_slice %1 {offsets = [0, 3], sizes = [256, 1], strides = [1, 1]} : vector<256x8xf32> to vector<256x1xf32>
    %9 = arith.fptosi %8 : vector<256x1xf32> to vector<256x1xi32>
    %c10_i32 = arith.constant 10 : i32
    %10 = vector.broadcast %c10_i32 : i32 to vector<256x1xi32>
    %11 = arith.minsi %9, %10 : vector<256x1xi32>
    %12 = vector.extract_strided_slice %1 {offsets = [0, 4], sizes = [256, 1], strides = [1, 1]} : vector<256x8xf32> to vector<256x1xf32>
    %13 = vector.extract_strided_slice %1 {offsets = [0, 5], sizes = [256, 1], strides = [1, 1]} : vector<256x8xf32> to vector<256x1xf32>
    %14 = vector.broadcast %3 : vector<256x1xi32> to vector<256x128xi32>
    %15 = arith.cmpi eq, %0, %14 : vector<256x128xi32>
    %c20_i32 = arith.constant 20 : i32
    %16 = vector.broadcast %c20_i32 : i32 to vector<256x1xi32>
    %17 = arith.addi %5, %16 : vector<256x1xi32>
    %18 = vector.broadcast %17 : vector<256x1xi32> to vector<256x128xi32>
    %19 = arith.cmpi eq, %0, %18 : vector<256x128xi32>
    %20 = arith.ori %15, %19 : vector<256x128xi1>
    %c40_i32 = arith.constant 40 : i32
    %21 = vector.broadcast %c40_i32 : i32 to vector<256x1xi32>
    %22 = arith.addi %7, %21 : vector<256x1xi32>
    %23 = vector.broadcast %22 : vector<256x1xi32> to vector<256x128xi32>
    %24 = arith.cmpi eq, %0, %23 : vector<256x128xi32>
    %25 = arith.ori %20, %24 : vector<256x128xi1>
    %c42_i32 = arith.constant 42 : i32
    %26 = vector.broadcast %c42_i32 : i32 to vector<256x1xi32>
    %27 = arith.addi %11, %26 : vector<256x1xi32>
    %28 = vector.broadcast %27 : vector<256x1xi32> to vector<256x128xi32>
    %29 = arith.cmpi eq, %0, %28 : vector<256x128xi32>
    %30 = arith.ori %25, %29 : vector<256x128xi1>
    %c53_i32 = arith.constant 53 : i32
    %31 = vector.broadcast %c53_i32 : i32 to vector<256x128xi32>
    %32 = arith.cmpi eq, %0, %31 : vector<256x128xi32>
    %33 = arith.extui %30 : vector<256x128xi1> to vector<256x128xi32>
    %34 = arith.sitofp %33 : vector<256x128xi32> to vector<256x128xf32>
    %35 = vector.shape_cast %12 : vector<256x1xf32> to vector<256x1xf32>
    %36 = vector.broadcast %35 : vector<256x1xf32> to vector<256x128xf32>
    %37 = arith.select %32, %36, %34 : vector<256x128xi1>, vector<256x128xf32>
    %38 = vector.broadcast %13 : vector<256x1xf32> to vector<256x128xf32>
    %39 = arith.mulf %37, %38 : vector<256x128xf32>
    %c0_1 = arith.constant 0 : index
    %c0_2 = arith.constant 0 : index
    %40 = vector.load %arg2[%c0_1, %c0_2] : memref<256x128xf32, #tpu.memory_space<vmem>>, vector<256x128xf32>
    tpu.vector_store %arg2[%c0_1, %c0_2], %39 {strides = array<i32>} : memref<256x128xf32, #tpu.memory_space<vmem>>, vector<256x128xf32>,
    return
  }
  func.func @transform_0(%arg0: i32) -> (i32, i32) {
    %c0_i32 = arith.constant 0 : i32
    %c0_i32_0 = arith.constant 0 : i32
    return %arg0, %c0_i32 : i32, i32
  }
  func.func @transform_1(%arg0: i32) -> (i32, i32) {
    %c0_i32 = arith.constant 0 : i32
    %c0_i32_0 = arith.constant 0 : i32
    return %arg0, %c0_i32 : i32, i32
  }
}

</mosaic_0001>

<bundles_post_ra>
// kernel: graph_rewiring_forward.1
= control target key start
LH: loop header
LB: loop body
LE: loop exit
PB: predicated region body
PF: predicated region fallthrough
CT: control target
= control target key end

     0   :  { %s1752_s6 = smov 0   ;;  %s3107_s0 = inlined_call_operand.vmem [shape: f32[512,8], index: 0, kind: input, shape index: {}]   ;;  %s3108_s1 = inlined_call_operand.vmem [shape: f32[512,128], index: 1, kind: output, shape index: {}]  }
   0x1 LB: > { %s1459_s7 = sadd.s32 4294967295, %s1733_s6   ;;  %p1463_p0 = scmp.ge.s32.totalorder %s1733_s6, 1  ;;  %s1733_s6 = sphi %s1752_s6, %s11_s6  }
   0x2   : > { %p88_p1 = scmp.lt.s32.totalorder %s1733_s6, 3 }
   0x4   : > { %p89_p2 = pnand %p1463_p0, %p88_p1 }
   0x6   : > { %92 = sbr.rel (%p89_p2) target bundleno = 667 (0x29b), region = 24 }
   0xb   : > { %s1464_s8 = sshll.u32 %s1459_s7, 5  ;;  %v1735_v0 = vmov 0  }
   0xc   : > { %1679 = vset.pattern.permute.xlu2 %v1735_v0  ;;  %1678 = vset.pattern.permute.xlu1 %v1735_v0  ;;  %p109_p3 = scmp.lt.s32.totalorder %s1464_s8, 63 }
   0xd   : > { %1677 = vset.pattern.permute.xlu0 %v1735_v0 }
   0xe   : > { %s3338_s8 = smov (!%p109_p3, %s1464_s8), 63 }
   0xf   : > { %s1465_s9 = sshll.u32 %s3338_s8, 3 }
  0x10   : > { %s1768_s12 = scalar_lea.vmem %s3107_s0, %s1465_s9  ;;  %s3013_s15 = scalar_lea.vmem %s3108_s1, %s1465_s9 }
  0x11   : > { %v126_v1 = vld [vmem:[%s1768_s12 + $0x20] sm:$0xff]  ;;  %v124_v2 = vld [vmem:[%s1768_s12 + $0x10] sm:$0xff]  ;;  %v127_v6 = vld [vmem:[%s1768_s12 + $0x28] sm:$0xff] }
  0x12   : > { %v122_v3 = vld [vmem:[%s1768_s12] sm:$0xff]  ;;  %vm1522_vm0 = vcmp.lt.s32.totalorder %v126_v1, 0  ;;  %v1523_v4 = vceil.f32 %v126_v1  ;;  %v1524_v5 = vfloor.f32 %v126_v1  ;;  %vm1512_vm1 = vcmp.lt.s32.totalorder %v124_v2, 0  ;;  %v125_v7 = vld [vmem:[%s1768_s12 + $0x18] sm:$0xff]  ;;  %v123_v14 = vld [vmem:[%s1768_s12 + $0x8] sm:$0xff] }
  0x13   : > { %v1513_v8 = vceil.f32 %v124_v2  ;;  %v1514_v9 = vfloor.f32 %v124_v2  ;;  %vm1502_vm2 = vcmp.lt.s32.totalorder %v122_v3, 0  ;;  %v1503_v10 = vceil.f32 %v122_v3  ;;  %v130_v27 = vld [vmem:[%s1768_s12 + $0x40] sm:$0xff]  ;;  %v129_v29 = vld [vmem:[%s1768_s12 + $0x38] sm:$0xff]  ;;  %v128_v31 = vld [vmem:[%s1768_s12 + $0x30] sm:$0xff] }
  0x14   : > { %v1525_v11 = vsel %vm1522_vm0, %v1523_v4, %v1524_v5  ;;  %v1504_v12 = vfloor.f32 %v122_v3  ;;  %vm1527_vm3 = vcmp.lt.s32.totalorder %v127_v6, 0  ;;  %v1528_v13 = vceil.f32 %v127_v6  ;;  %v133_v42 = vld [vmem:[%s1768_s12 + $0x58] sm:$0xff]  ;;  %v132_v44 = vld [vmem:[%s1768_s12 + $0x50] sm:$0xff]  ;;  %v131_v46 = vld [vmem:[%s1768_s12 + $0x48] sm:$0xff] }
  0x15   : > { %v1776_v15 = vcvt.f32.s32 %v1525_v11  ;;  %v1515_v16 = vsel %vm1512_vm1, %v1513_v8, %v1514_v9  ;;  %v1529_v17 = vfloor.f32 %v127_v6  ;;  %vm1517_vm4 = vcmp.lt.s32.totalorder %v125_v7, 0  ;;  %v136_v57 = vld [vmem:[%s1768_s12 + $0x70] sm:$0xff]  ;;  %v135_v59 = vld [vmem:[%s1768_s12 + $0x68] sm:$0xff]  ;;  %v134_v61 = vld [vmem:[%s1768_s12 + $0x60] sm:$0xff] }
  0x16   : > { %v1778_v18 = vcvt.f32.s32 %v1515_v16  ;;  %v1505_v19 = vsel %vm1502_vm2, %v1503_v10, %v1504_v12  ;;  %v1518_v20 = vceil.f32 %v125_v7  ;;  %v1519_v21 = vfloor.f32 %v125_v7  ;;  %v139_v8 = vld [vmem:[%s1768_s12 + $0x88] sm:$0xff]  ;;  %v138_v10 = vld [vmem:[%s1768_s12 + $0x80] sm:$0xff]  ;;  %v137_v12 = vld [vmem:[%s1768_s12 + $0x78] sm:$0xff] }
  0x17   : > { %263 = vperm.xlu2 %1679, %v1776_v15   ;;  %v1781_v22 = vcvt.f32.s32 %v1505_v19  ;;  %vm1507_vm5 = vcmp.lt.s32.totalorder %v123_v14, 0  ;;  %v1508_v23 = vceil.f32 %v123_v14  ;;  %v1530_v24 = vsel %vm1527_vm3, %v1528_v13, %v1529_v17 }
  0x18   : > { %257 = vperm.xlu1 %1678, %v1778_v18   ;;  %v1509_v25 = vfloor.f32 %v123_v14  ;;  %v1520_v26 = vsel %vm1517_vm4, %v1518_v20, %v1519_v21  ;;  %v1788_v30 = vcvt.f32.s32 %v1530_v24  ;;  %v1543_v33 = vceil.f32 %v130_v27 }
  0x19   : > { %251 = vperm.xlu0 %1677, %v1781_v22   ;;  %v1791_v32 = vcvt.f32.s32 %v1520_v26  ;;  %v1544_v34 = vfloor.f32 %v130_v27  ;;  %vm1542_vm6 = vcmp.lt.s32.totalorder %v130_v27, 0  ;;  %v1538_v36 = vceil.f32 %v129_v29  ;;  %v142_v26 = vld [vmem:[%s1768_s12 + $0xa0] sm:$0xff] }
  0x1a   : > { %v1510_v28 = vsel %vm1507_vm5, %v1508_v23, %v1509_v25  ;;  %v1539_v37 = vfloor.f32 %v129_v29  ;;  %vm1537_vm7 = vcmp.lt.s32.totalorder %v129_v29, 0  ;;  %v1533_v38 = vceil.f32 %v128_v31 }
  0x1b   : > { %v1793_v35 = vcvt.f32.s32 %v1510_v28  ;;  %v1534_v39 = vfloor.f32 %v128_v31  ;;  %vm1532_vm8 = vcmp.lt.s32.totalorder %v128_v31, 0  ;;  %v1545_v40 = vsel %vm1542_vm6, %v1543_v33, %v1544_v34  ;;  %v141_v28 = vld [vmem:[%s1768_s12 + $0x98] sm:$0xff]  ;;  %v140_v31 = vld [vmem:[%s1768_s12 + $0x90] sm:$0xff] }
  0x1c   : > { %v1540_v41 = vsel %vm1537_vm7, %v1538_v36, %v1539_v37  ;;  %v1800_v45 = vcvt.f32.s32 %v1545_v40  ;;  %v1558_v48 = vceil.f32 %v133_v42  ;;  %v1559_v49 = vfloor.f32 %v133_v42 }
  0x1d   : > { %v1535_v43 = vsel %vm1532_vm8, %v1533_v38, %v1534_v39  ;;  %v1803_v47 = vcvt.f32.s32 %v1540_v41  ;;  %vm1557_vm9 = vcmp.lt.s32.totalorder %v133_v42, 0  ;;  %v1553_v51 = vceil.f32 %v132_v44 }
  0x1e   : > { %v1805_v50 = vcvt.f32.s32 %v1535_v43  ;;  %v1554_v52 = vfloor.f32 %v132_v44  ;;  %vm1552_vm10 = vcmp.lt.s32.totalorder %v132_v44, 0  ;;  %v1548_v53 = vceil.f32 %v131_v46  ;;  %v145_v44 = vld [vmem:[%s1768_s12 + $0xb8] sm:$0xff] }
  0x1f   : > { %266 = vperm.xlu2 %1679, %v1788_v30   ;;  %v1549_v54 = vfloor.f32 %v131_v46  ;;  %vm1547_vm11 = vcmp.lt.s32.totalorder %v131_v46, 0  ;;  %v1560_v55 = vsel %vm1557_vm9, %v1558_v48, %v1559_v49  ;;  %v1573_v63 = vceil.f32 %v136_v57  ;;  %v144_v48 = vld [vmem:[%s1768_s12 + $0xb0] sm:$0xff] }
  0x20   : > { %260 = vperm.xlu1 %1678, %v1791_v32   ;;  %v1555_v56 = vsel %vm1552_vm10, %v1553_v51, %v1554_v52  ;;  %v1812_v60 = vcvt.f32.s32 %v1560_v55  ;;  %v1574_v0 = vfloor.f32 %v136_v57  ;;  %vm1572_vm12 = vcmp.lt.s32.totalorder %v136_v57, 0  ;;  %v143_v51 = vld [vmem:[%s1768_s12 + $0xa8] sm:$0xff] }
  0x21   : > { %254 = vperm.xlu0 %1677, %v1793_v35   ;;  %v1550_v58 = vsel %vm1547_vm11, %v1548_v53, %v1549_v54  ;;  %v1815_v62 = vcvt.f32.s32 %v1555_v56  ;;  %v1568_v2 = vceil.f32 %v135_v59  ;;  %v1569_v3 = vfloor.f32 %v135_v59 }
  0x22   : > { %v1817_v1 = vcvt.f32.s32 %v1550_v58  ;;  %vm1567_vm13 = vcmp.lt.s32.totalorder %v135_v59, 0  ;;  %v1563_v4 = vceil.f32 %v134_v61  ;;  %v1564_v5 = vfloor.f32 %v134_v61 }
  0x23   : > { %vm1562_vm14 = vcmp.lt.s32.totalorder %v134_v61, 0  ;;  %v1575_v6 = vsel %vm1572_vm12, %v1573_v63, %v1574_v0  ;;  %v1570_v7 = vsel %vm1567_vm13, %v1568_v2, %v1569_v3  ;;  %v1588_v14 = vceil.f32 %v139_v8  ;;  %v148_v0 = vld [vmem:[%s1768_s12 + $0xd0] sm:$0xff]  ;;  %v147_v3 = vld [vmem:[%s1768_s12 + $0xc8] sm:$0xff] }
  0x24   : > { %v1565_v9 = vsel %vm1562_vm14, %v1563_v4, %v1564_v5  ;;  %v1824_v11 = vcvt.f32.s32 %v1575_v6  ;;  %v1827_v13 = vcvt.f32.s32 %v1570_v7  ;;  %v1589_v16 = vfloor.f32 %v139_v8  ;;  %v146_v5 = vld [vmem:[%s1768_s12 + $0xc0] sm:$0xff] }
  0x25   : > { %v1829_v17 = vcvt.f32.s32 %v1565_v9  ;;  %vm1587_vm15 = vcmp.lt.s32.totalorder %v139_v8, 0  ;;  %v1583_v19 = vceil.f32 %v138_v10  ;;  %v1584_v20 = vfloor.f32 %v138_v10 }
  0x26   : > { %vm1582_vm0 = vcmp.lt.s32.totalorder %v138_v10, 0  ;;  %v1578_v21 = vceil.f32 %v137_v12  ;;  %v1579_v23 = vfloor.f32 %v137_v12  ;;  %vm1577_vm1 = vcmp.lt.s32.totalorder %v137_v12, 0 }
  0x27   : > { %275 = vperm.xlu2 %1679, %v1800_v45   ;;  %v1590_v24 = vsel %vm1587_vm15, %v1588_v14, %v1589_v16  ;;  %v1585_v25 = vsel %vm1582_vm0, %v1583_v19, %v1584_v20  ;;  %v1603_v34 = vceil.f32 %v142_v26  ;;  %v1604_v36 = vfloor.f32 %v142_v26 }
  0x28   : > { %272 = vperm.xlu1 %1678, %v1803_v47   ;;  %v1580_v27 = vsel %vm1577_vm1, %v1578_v21, %v1579_v23  ;;  %v1836_v29 = vcvt.f32.s32 %v1590_v24  ;;  %v1839_v33 = vcvt.f32.s32 %v1585_v25  ;;  %vm1602_vm2 = vcmp.lt.s32.totalorder %v142_v26, 0  ;;  %v151_v21 = vld [vmem:[%s1768_s12 + $0xe8] sm:$0xff]  ;;  %v150_v24 = vld [vmem:[%s1768_s12 + $0xe0] sm:$0xff]  ;;  %v149_v26 = vld [vmem:[%s1768_s12 + $0xd8] sm:$0xff] }
  0x29   : > { %269 = vperm.xlu0 %1677, %v1805_v50   ;;  %v1841_v37 = vcvt.f32.s32 %v1580_v27  ;;  %v1598_v38 = vceil.f32 %v141_v28  ;;  %v1599_v39 = vfloor.f32 %v141_v28  ;;  %vm1597_vm3 = vcmp.lt.s32.totalorder %v141_v28, 0 }
  0x2a   : > { %v1593_v40 = vceil.f32 %v140_v31  ;;  %v1594_v41 = vfloor.f32 %v140_v31  ;;  %vm1592_vm4 = vcmp.lt.s32.totalorder %v140_v31, 0  ;;  %v1605_v42 = vsel %vm1602_vm2, %v1603_v34, %v1604_v36 }
  0x2b   : > { %v1600_v43 = vsel %vm1597_vm3, %v1598_v38, %v1599_v39  ;;  %v1848_v49 = vcvt.f32.s32 %v1605_v42  ;;  %v1618_v53 = vceil.f32 %v145_v44  ;;  %v1619_v54 = vfloor.f32 %v145_v44 }
  0x2c   : > { %v1595_v46 = vsel %vm1592_vm4, %v1593_v40, %v1594_v41  ;;  %v1851_v52 = vcvt.f32.s32 %v1600_v43  ;;  %vm1617_vm5 = vcmp.lt.s32.totalorder %v145_v44, 0  ;;  %v1613_v56 = vceil.f32 %v144_v48  ;;  %v153_v44 = vld [vmem:[%s1768_s12 + $0xf8] sm:$0xff] }
  0x2d   : > { %v1853_v55 = vcvt.f32.s32 %v1595_v46  ;;  %v1614_v57 = vfloor.f32 %v144_v48  ;;  %vm1612_vm6 = vcmp.lt.s32.totalorder %v144_v48, 0  ;;  %v1608_v58 = vceil.f32 %v143_v51  ;;  %v152_v48 = vld [vmem:[%s1768_s12 + $0xf0] sm:$0xff] }
  0x2e   : > { %v1609_v59 = vfloor.f32 %v143_v51  ;;  %vm1607_vm7 = vcmp.lt.s32.totalorder %v143_v51, 0  ;;  %v1620_v61 = vsel %vm1617_vm5, %v1618_v53, %v1619_v54  ;;  %v1633_v7 = vceil.f32 %v148_v0 }
  0x2f   : > { %284 = vperm.xlu2 %1679, %v1812_v60   ;;  %v1615_v63 = vsel %vm1612_vm6, %v1613_v56, %v1614_v57  ;;  %v1860_v4 = vcvt.f32.s32 %v1620_v61  ;;  %v1634_v8 = vfloor.f32 %v148_v0  ;;  %vm1632_vm8 = vcmp.lt.s32.totalorder %v148_v0, 0 }
  0x30   : > { %281 = vperm.xlu1 %1678, %v1815_v62   ;;  %v1610_v2 = vsel %vm1607_vm7, %v1608_v58, %v1609_v59  ;;  %v1863_v6 = vcvt.f32.s32 %v1615_v63  ;;  %v1628_v10 = vceil.f32 %v147_v3  ;;  %v1629_v12 = vfloor.f32 %v147_v3 }
  0x31   : > { %278 = vperm.xlu0 %1677, %v1817_v1   ;;  %v1865_v9 = vcvt.f32.s32 %v1610_v2  ;;  %vm1627_vm9 = vcmp.lt.s32.totalorder %v147_v3, 0  ;;  %v1623_v14 = vceil.f32 %v146_v5  ;;  %v1624_v16 = vfloor.f32 %v146_v5 }
  0x32   : > { %vm1622_vm10 = vcmp.lt.s32.totalorder %v146_v5, 0  ;;  %v1635_v19 = vsel %vm1632_vm8, %v1633_v7, %v1634_v8  ;;  %v1630_v20 = vsel %vm1627_vm9, %v1628_v10, %v1629_v12  ;;  %v1648_v28 = vceil.f32 %v151_v21 }
  0x33   : > { %v1625_v23 = vsel %vm1622_vm10, %v1623_v14, %v1624_v16  ;;  %v1872_v25 = vcvt.f32.s32 %v1635_v19  ;;  %v1875_v27 = vcvt.f32.s32 %v1630_v20  ;;  %v1649_v31 = vfloor.f32 %v151_v21 }
  0x34   : > { %v1877_v34 = vcvt.f32.s32 %v1625_v23  ;;  %vm1647_vm11 = vcmp.lt.s32.totalorder %v151_v21, 0  ;;  %v1643_v36 = vceil.f32 %v150_v24  ;;  %v1644_v38 = vfloor.f32 %v150_v24 }
  0x35   : > { %vm1642_vm12 = vcmp.lt.s32.totalorder %v150_v24, 0  ;;  %v1638_v39 = vceil.f32 %v149_v26  ;;  %v1639_v40 = vfloor.f32 %v149_v26  ;;  %vm1637_vm13 = vcmp.lt.s32.totalorder %v149_v26, 0 }
  0x36   : > { %v1650_v41 = vsel %vm1647_vm11, %v1648_v28, %v1649_v31  ;;  %v1645_v42 = vsel %vm1642_vm12, %v1643_v36, %v1644_v38  ;;  %v1658_v54 = vceil.f32 %v153_v44  ;;  %v1659_v56 = vfloor.f32 %v153_v44 }
  0x37   : > { %293 = vperm.xlu2 %1679, %v1824_v11   ;;  %v1640_v43 = vsel %vm1637_vm13, %v1638_v39, %v1639_v40  ;;  %v1883_v46 = vcvt.f32.s32 %v1650_v41  ;;  %v1886_v51 = vcvt.f32.s32 %v1645_v42  ;;  %vm1657_vm14 = vcmp.lt.s32.totalorder %v153_v44, 0 }
  0x38   : > { %290 = vperm.xlu1 %1678, %v1827_v13   ;;  %v1888_v53 = vcvt.f32.s32 %v1640_v43  ;;  %v1653_v57 = vceil.f32 %v152_v48  ;;  %v1654_v58 = vfloor.f32 %v152_v48  ;;  %vm1652_vm15 = vcmp.lt.s32.totalorder %v152_v48, 0 }
  0x39   : > { %287 = vperm.xlu0 %1677, %v1829_v17   ;;  %v1660_v59 = vsel %vm1657_vm14, %v1658_v54, %v1659_v56  ;;  %v378_v0 = vadd.s32 20, %v1781_v22  ;;  %v1736_v3 = vmov 1   ;;  %v381_v5 = vadd.s32 20, %v1791_v32 }
  0x3a   : > { %v1655_v61 = vsel %vm1652_vm15, %v1653_v57, %v1654_v58  ;;  %v1893_v63 = vcvt.f32.s32 %v1660_v59  ;;  %v380_v7 = vadd.s32 20, %v1778_v18  ;;  %v379_v8 = vadd.s32 20, %v1793_v35 }
  0x3b   : > { %v1896_v2 = vcvt.f32.s32 %v1655_v61  ;;  %v383_v12 = vadd.s32 20, %v1788_v30  ;;  %v382_v14 = vadd.s32 20, %v1776_v15  ;;  %v384_v16 = vadd.s32 20, %v1805_v50 }
  0x3c   : > { %3116 = vst [vmem:[#allocation2_spill] sm:$0xff] %v1893_v63  ;;  %v386_v20 = vadd.s32 20, %v1800_v45  ;;  %v385_v21 = vadd.s32 20, %v1803_v47  ;;  %v387_v23 = vadd.s32 20, %v1817_v1  ;;  %v389_v26 = vadd.s32 20, %v1812_v60 }
  0x3d   : > { %v388_v28 = vadd.s32 20, %v1815_v62  ;;  %v390_v31 = vadd.s32 20, %v1829_v17  ;;  %v392_v40 = vadd.s32 20, %v1824_v11  ;;  %v391_v41 = vadd.s32 20, %v1827_v13 }
  0x3e   : > { %v393_v42 = vadd.s32 20, %v1841_v37  ;;  %v395_v54 = vadd.s32 20, %v1836_v29  ;;  %v394_v56 = vadd.s32 20, %v1839_v33  ;;  %v396_v57 = vadd.s32 20, %v1853_v55 }
  0x3f   : > { %302 = vperm.xlu2 %1679, %v1836_v29   ;;  %vm188_vm0 = vcmp.lt.s32.totalorder %v1793_v35, 10  ;;  %vm186_vm1 = vcmp.lt.s32.totalorder %v1781_v22, 10  ;;  %vm198_vm2 = vcmp.lt.s32.totalorder %v1805_v50, 10  ;;  %vm192_vm3 = vcmp.lt.s32.totalorder %v1791_v32, 10 }
  0x40   : > { %299 = vperm.xlu1 %1678, %v1839_v33   ;;  %vm190_vm4 = vcmp.lt.s32.totalorder %v1778_v18, 10  ;;  %vm204_vm5 = vcmp.lt.s32.totalorder %v1817_v1, 10  ;;  %vm196_vm6 = vcmp.lt.s32.totalorder %v1788_v30, 10  ;;  %vm194_vm7 = vcmp.lt.s32.totalorder %v1776_v15, 10 }
  0x41   : > { %296 = vperm.xlu0 %1677, %v1841_v37   ;;  %vm210_vm8 = vcmp.lt.s32.totalorder %v1829_v17, 10  ;;  %vm202_vm9 = vcmp.lt.s32.totalorder %v1800_v45, 10  ;;  %vm200_vm10 = vcmp.lt.s32.totalorder %v1803_v47, 10  ;;  %vm216_vm11 = vcmp.lt.s32.totalorder %v1841_v37, 10 }
  0x42   : > { %vm208_vm12 = vcmp.lt.s32.totalorder %v1812_v60, 10  ;;  %vm206_vm13 = vcmp.lt.s32.totalorder %v1815_v62, 10  ;;  %vm222_vm14 = vcmp.lt.s32.totalorder %v1853_v55, 10  ;;  %vm214_vm15 = vcmp.lt.s32.totalorder %v1824_v11, 10 }
  0x47   : > { %311 = vperm.xlu2 %1679, %v1848_v49  }
  0x48   : > { %308 = vperm.xlu1 %1678, %v1851_v52  }
  0x49   : > { %305 = vperm.xlu0 %1677, %v1853_v55  }
  0x4f   : > { %320 = vperm.xlu2 %1679, %v1860_v4  }
  0x50   : > { %317 = vperm.xlu1 %1678, %v1863_v6  }
  0x51   : > { %314 = vperm.xlu0 %1677, %v1865_v9  }
  0x57   : > { %329 = vperm.xlu2 %1679, %v1872_v25  }
  0x58   : > { %326 = vperm.xlu1 %1678, %v1875_v27  }
  0x59   : > { %323 = vperm.xlu0 %1677, %v1877_v34  }
  0x5f   : > { %338 = vperm.xlu2 %1679, %v1883_v46  }
  0x60   : > { %335 = vperm.xlu1 %1678, %v1886_v51  }
  0x61   : > { %332 = vperm.xlu0 %1677, %v1888_v53  }
  0x67   : > { %1680 = vset.pattern.permute.xlu2 %v1736_v3 }
  0x68   : > { %344 = vperm.xlu1 %1678, %v1893_v63   ;;  %411 = vperm.xlu2 %1680, %v378_v0   ;;  %v398_v0 = vadd.s32 20, %v1848_v49 }
  0x69   : > { %341 = vperm.xlu0 %1677, %v1896_v2  }
  0x70   : > { %1682 = vset.pattern.permute.xlu1 %v1736_v3  ;;  %420 = vperm.xlu2 %1680, %v381_v5   ;;  %v399_v5 = vadd.s32 20, %v1865_v9 }
  0x71   : > { %1681 = vset.pattern.permute.xlu0 %v1736_v3  ;;  %417 = vperm.xlu1 %1682, %v380_v7   ;;  %v1903_v10 = vpop.permute.xlu2 %263  ;;  %v397_v3 = vadd.s32 20, %v1851_v52 }
  0x72   : > { %3117 = vst [vmem:[#allocation3_spill] sm:$0xff] %v1903_v10  ;;  %414 = vperm.xlu0 %1681, %v379_v8   ;;  %v579_v10 = vadd.s32 40, %v1817_v1 }
  0x78   : > { %426 = vperm.xlu2 %1680, %v383_v12  }
  0x79   : > { %423 = vperm.xlu1 %1682, %v382_v14   ;;  %v1908_v19 = vpop.permute.xlu2 %266  ;;  %v401_v14 = vadd.s32 20, %v1860_v4 }
  0x7a   : > { %3118 = vst [vmem:[#allocation4_spill] sm:$0xff] %v1908_v19  ;;  %429 = vperm.xlu0 %1681, %v384_v16   ;;  %v400_v16 = vadd.s32 20, %v1863_v6 }
  0x80   : > { %435 = vperm.xlu2 %1680, %v386_v20   ;;  %v402_v20 = vadd.s32 20, %v1877_v34 }
  0x81   : > { %432 = vperm.xlu1 %1682, %v385_v21   ;;  %v1913_v24 = vpop.permute.xlu2 %275 }
  0x82   : > { %3119 = vst [vmem:[#allocation5_spill] sm:$0xff] %v1913_v24  ;;  %438 = vperm.xlu0 %1681, %v387_v23  }
  0x88   : > { %444 = vperm.xlu2 %1680, %v389_v26  }
  0x89   : > { %441 = vperm.xlu1 %1682, %v388_v28   ;;  %v1918_v36 = vpop.permute.xlu2 %284  ;;  %v404_v28 = vadd.s32 20, %v1872_v25 }
  0x8a   : > { %3120 = vst [vmem:[#allocation6_spill] sm:$0xff] %v1918_v36  ;;  %447 = vperm.xlu0 %1681, %v390_v31   ;;  %v1920_v38 = vpop.permute.xlu1 %257  ;;  %v403_v31 = vadd.s32 20, %v1875_v27 }
  0x8b   : > { %3121 = vst [vmem:[#allocation7_spill] sm:$0xff] %v1920_v38  ;;  %v1922_v39 = vpop.permute.xlu0 %251  ;;  %v582_v38 = vadd.s32 40, %v1829_v17 }
  0x8c   : > { %3122 = vst [vmem:[#allocation8_spill] sm:$0xff] %v1922_v39 }
  0x90   : > { %453 = vperm.xlu2 %1680, %v392_v40   ;;  %v405_v40 = vadd.s32 20, %v1888_v53 }
  0x91   : > { %450 = vperm.xlu1 %1682, %v391_v41   ;;  %v1927_v43 = vpop.permute.xlu2 %293 }
  0x92   : > { %3123 = vst [vmem:[#allocation9_spill] sm:$0xff] %v1927_v43  ;;  %456 = vperm.xlu0 %1681, %v393_v42   ;;  %v1929_v44 = vpop.permute.xlu1 %260 }
  0x93   : > { %3124 = vst [vmem:[#allocation10_spill] sm:$0xff] %v1929_v44  ;;  %v1931_v48 = vpop.permute.xlu0 %254  ;;  %v600_v44 = vadd.s32 40, %v1896_v2 }
  0x94   : > { %3125 = vst [vmem:[#allocation11_spill] sm:$0xff] %v1931_v48 }
  0x98   : > { %462 = vperm.xlu2 %1680, %v395_v54  }
  0x99   : > { %459 = vperm.xlu1 %1682, %v394_v56   ;;  %v1936_v58 = vpop.permute.xlu2 %302  ;;  %v407_v56 = vadd.s32 20, %v1883_v46 }
  0x9a   : > { %465 = vperm.xlu0 %1681, %v396_v57   ;;  %v1938_v59 = vpop.permute.xlu1 %272  ;;  %v406_v57 = vadd.s32 20, %v1886_v51 }
  0x9b   : > { %3126 = vst [vmem:[#allocation12_spill] sm:$0xff] %v1938_v59  ;;  %v1940_v61 = vpop.permute.xlu0 %269  ;;  %v574_v59 = vadd.s32 40, %v1776_v15 }
  0xa0   : > { %471 = vperm.xlu2 %1680, %v398_v0   ;;  %v408_v0 = vadd.s32 20, %v1896_v2 }
  0xa1   : > { %468 = vperm.xlu1 %1682, %v397_v3   ;;  %v1945_v7 = vpop.permute.xlu2 %311 }
  0xa2   : > { %474 = vperm.xlu0 %1681, %v399_v5   ;;  %v1947_v8 = vpop.permute.xlu1 %281 }
  0xa3   : > { %3127 = vst [vmem:[#allocation13_spill] sm:$0xff] %v1947_v8  ;;  %v1949_v12 = vpop.permute.xlu0 %278 }
  0xa8   : > { %480 = vperm.xlu2 %1680, %v401_v14  }
  0xa9   : > { %477 = vperm.xlu1 %1682, %v400_v16   ;;  %v1954_v21 = vpop.permute.xlu2 %320  ;;  %v409_v16 = vadd.s32 20, %v1893_v63 }
  0xaa   : > { %483 = vperm.xlu0 %1681, %v402_v20   ;;  %v1956_v23 = vpop.permute.xlu1 %290  ;;  %v570_v20 = vadd.s32 40, %v1781_v22 }
  0xab   : > { %3128 = vst [vmem:[#allocation14_spill] sm:$0xff] %v1956_v23  ;;  %v1958_v26 = vpop.permute.xlu0 %287  ;;  %v576_v23 = vadd.s32 40, %v1805_v50 }
  0xb0   : > { %489 = vperm.xlu2 %1680, %v404_v28   ;;  %v571_v28 = vadd.s32 40, %v1793_v35 }
  0xb1   : > { %486 = vperm.xlu1 %1682, %v403_v31   ;;  %v1963_v41 = vpop.permute.xlu2 %329  ;;  %v1737_v31 = vmov 2  }
  0xb2   : > { %492 = vperm.xlu0 %1681, %v405_v40   ;;  %v1965_v42 = vpop.permute.xlu1 %299 }
  0xb3   : > { %3129 = vst [vmem:[#allocation15_spill] sm:$0xff] %v1965_v42  ;;  %v1967_v54 = vpop.permute.xlu0 %296  ;;  %v572_v42 = vadd.s32 40, %v1778_v18 }
  0xb8   : > { %498 = vperm.xlu2 %1680, %v407_v56  }
  0xb9   : > { %495 = vperm.xlu1 %1682, %v406_v57   ;;  %v1972_v3 = vpop.permute.xlu2 %338 }
  0xba   : > { %501 = vperm.xlu0 %1681, %v408_v0   ;;  %v1974_v5 = vpop.permute.xlu1 %308  ;;  %v573_v0 = vadd.s32 40, %v1791_v32 }
  0xbb   : > { %3130 = vst [vmem:[#allocation16_spill] sm:$0xff] %v1974_v5  ;;  %v1976_v14 = vpop.permute.xlu0 %305 }
  0xc0   : > { %1683 = vset.pattern.permute.xlu2 %v1737_v31 }
  0xc1   : > { %504 = vperm.xlu1 %1682, %v409_v16   ;;  %603 = vperm.xlu2 %1683, %v570_v20  }
  0xc2   : > { %1684 = vset.pattern.permute.xlu0 %v1737_v31  ;;  %v1981_v40 = vpop.permute.xlu1 %317  ;;  %v1983_v56 = vpop.permute.xlu2 %411 }
  0xc3   : > { %3131 = vst [vmem:[#allocation17_spill] sm:$0xff] %v1981_v40  ;;  %606 = vperm.xlu0 %1684, %v571_v28   ;;  %v1985_v57 = vpop.permute.xlu0 %314  ;;  %v575_v28 = vadd.s32 40, %v1788_v30 }
  0xc4   : > { %3132 = vst [vmem:[#allocation18_spill] sm:$0xff] %v1983_v56 }
  0xc9   : > { %1685 = vset.pattern.permute.xlu1 %v1737_v31  ;;  %612 = vperm.xlu2 %1683, %v573_v0  }
  0xca   : > { %v1990_v8 = vpop.permute.xlu1 %326  ;;  %609 = vperm.xlu1 %1685, %v572_v42   ;;  %v1992_v16 = vpop.permute.xlu2 %420  ;;  %v578_v42 = vadd.s32 40, %v1800_v45 }
  0xcb   : > { %3133 = vst [vmem:[#allocation19_spill] sm:$0xff] %v1990_v8  ;;  %621 = vperm.xlu0 %1684, %v576_v23   ;;  %v1994_v20 = vpop.permute.xlu0 %323  ;;  %v577_v23 = vadd.s32 40, %v1803_v47 }
  0xcc   : > { %3134 = vst [vmem:[#allocation20_spill] sm:$0xff] %v1992_v16 }
  0xcd   : > { %3135 = vst [vmem:[#allocation21_spill] sm:$0xff] %v1994_v20 }
  0xd1   : > { %618 = vperm.xlu2 %1683, %v575_v28  }
  0xd2   : > { %v1999_v43 = vpop.permute.xlu1 %335  ;;  %615 = vperm.xlu1 %1685, %v574_v59   ;;  %v2001_v31 = vpop.permute.xlu2 %426  ;;  %v581_v59 = vadd.s32 40, %v1812_v60 }
  0xd3   : > { %3136 = vst [vmem:[#allocation22_spill] sm:$0xff] %v1999_v43  ;;  %630 = vperm.xlu0 %1684, %v579_v10   ;;  %v2003_v0 = vpop.permute.xlu0 %332  ;;  %v580_v10 = vadd.s32 40, %v1815_v62  ;;  %v585_v43 = vadd.s32 40, %v1841_v37 }
  0xd4   : > { %3137 = vst [vmem:[#allocation23_spill] sm:$0xff] %v2001_v31 }
  0xd5   : > { %3138 = vst [vmem:[#allocation24_spill] sm:$0xff] %v2003_v0  ;;  %v598_v0 = vadd.s32 40, %v1886_v51 }
  0xd9   : > { %627 = vperm.xlu2 %1683, %v578_v42  }
  0xda   : > { %v2008_v36 = vpop.permute.xlu1 %344  ;;  %624 = vperm.xlu1 %1685, %v577_v23   ;;  %v2010_v24 = vpop.permute.xlu2 %435  ;;  %v584_v23 = vadd.s32 40, %v1824_v11 }
  0xdb   : > { %3139 = vst [vmem:[#allocation25_spill] sm:$0xff] %v2008_v36  ;;  %639 = vperm.xlu0 %1684, %v582_v38   ;;  %v2012_v28 = vpop.permute.xlu0 %341  ;;  %v583_v38 = vadd.s32 40, %v1827_v13 }
  0xdc   : > { %3140 = vst [vmem:[#allocation26_spill] sm:$0xff] %v2010_v24  ;;  %v588_v24 = vadd.s32 40, %v1853_v55 }
  0xdd   : > { %3141 = vst [vmem:[#allocation27_spill] sm:$0xff] %v2012_v28  ;;  %v597_v28 = vadd.s32 40, %v1888_v53 }
  0xe1   : > { %636 = vperm.xlu2 %1683, %v581_v59  }
  0xe2   : > { %633 = vperm.xlu1 %1685, %v580_v10   ;;  %v2017_v48 = vpop.permute.xlu2 %444 }
  0xe3   : > { %3142 = vst [vmem:[#allocation28_spill] sm:$0xff] %v2017_v48  ;;  %648 = vperm.xlu0 %1684, %v585_v43   ;;  %v2019_v42 = vpop.permute.xlu1 %417  ;;  %v587_v43 = vadd.s32 40, %v1836_v29  ;;  %v591_v48 = vadd.s32 40, %v1865_v9 }
  0xe4   : > { %3143 = vst [vmem:[#allocation29_spill] sm:$0xff] %v2019_v42  ;;  %v2021_v36 = vpop.permute.xlu0 %414  ;;  %v586_v42 = vadd.s32 40, %v1839_v33 }
  0xe5   : > { %3144 = vst [vmem:[#allocation30_spill] sm:$0xff] %v2021_v36 }
  0xe9   : > { %645 = vperm.xlu2 %1683, %v584_v23  }
  0xea   : > { %642 = vperm.xlu1 %1685, %v583_v38   ;;  %v2026_v19 = vpop.permute.xlu2 %453 }
  0xeb   : > { %3145 = vst [vmem:[#allocation31_spill] sm:$0xff] %v2026_v19  ;;  %657 = vperm.xlu0 %1684, %v588_v24   ;;  %v2028_v59 = vpop.permute.xlu1 %423  ;;  %v590_v24 = vadd.s32 40, %v1848_v49  ;;  %v594_v19 = vadd.s32 40, %v1877_v34 }
  0xec   : > { %3146 = vst [vmem:[#allocation32_spill] sm:$0xff] %v2028_v59  ;;  %v2030_v10 = vpop.permute.xlu0 %429  ;;  %v589_v59 = vadd.s32 40, %v1851_v52 }
  0xf1   : > { %654 = vperm.xlu2 %1683, %v587_v43  }
  0xf2   : > { %651 = vperm.xlu1 %1685, %v586_v42   ;;  %v2035_v36 = vpop.permute.xlu2 %462 }
  0xf3   : > { %666 = vperm.xlu0 %1684, %v591_v48   ;;  %v2037_v23 = vpop.permute.xlu1 %432  ;;  %v593_v48 = vadd.s32 40, %v1860_v4 }
  0xf4   : > { %3147 = vst [vmem:[#allocation33_spill] sm:$0xff] %v2037_v23  ;;  %v2039_v38 = vpop.permute.xlu0 %438  ;;  %v592_v23 = vadd.s32 40, %v1863_v6 }
  0xf9   : > { %663 = vperm.xlu2 %1683, %v590_v24  }
  0xfa   : > { %660 = vperm.xlu1 %1685, %v589_v59   ;;  %v2044_v31 = vpop.permute.xlu2 %471 }
  0xfb   : > { %675 = vperm.xlu0 %1684, %v594_v19   ;;  %v2046_v43 = vpop.permute.xlu1 %441  ;;  %v596_v19 = vadd.s32 40, %v1872_v25 }
  0xfc   : > { %3148 = vst [vmem:[#allocation34_spill] sm:$0xff] %v2046_v43  ;;  %v2048_v42 = vpop.permute.xlu0 %447  ;;  %v595_v43 = vadd.s32 40, %v1875_v27 }
 0x101   : > { %672 = vperm.xlu2 %1683, %v593_v48   ;;  %v599_v48 = vadd.s32 40, %v1883_v46 }
 0x102   : > { %669 = vperm.xlu1 %1685, %v592_v23   ;;  %v2053_v8 = vpop.permute.xlu2 %480 }
 0x103   : > { %684 = vperm.xlu0 %1684, %v597_v28   ;;  %v2055_v24 = vpop.permute.xlu1 %450 }
 0x104   : > { %3149 = vst [vmem:[#allocation35_spill] sm:$0xff] %v2055_v24  ;;  %v2057_v59 = vpop.permute.xlu0 %456  ;;  %v189_v24 = vsel %vm188_vm0, %v1793_v35, 10  ;;  %v199_v35 = vsel %vm198_vm2, %v1805_v50, 10  ;;  %vm212_vm0 = vcmp.lt.s32.totalorder %v1827_v13, 10 }
 0x105   : > { %v763_v40 = vadd.s32 42, %v189_v24  ;;  %v601_v24 = vadd.s32 40, %v1893_v63 }
 0x109   : > { %681 = vperm.xlu2 %1683, %v596_v19  }
 0x10a   : > { %678 = vperm.xlu1 %1685, %v595_v43   ;;  %v2062_v16 = vpop.permute.xlu2 %489 }
 0x10b   : > { %693 = vperm.xlu0 %1684, %v600_v44   ;;  %v2065_v23 = vpop.permute.xlu1 %459  ;;  %v1738_v44 = vmov 3  }
 0x10c   : > { %3150 = vst [vmem:[#allocation36_spill] sm:$0xff] %v2065_v23  ;;  %v2067_v28 = vpop.permute.xlu0 %465  ;;  %v187_v23 = vsel %vm186_vm1, %v1781_v22, 10  ;;  %vm228_vm1 = vcmp.lt.s32.totalorder %v1865_v9, 10 }
 0x10d   : > { %v762_v56 = vadd.s32 42, %v187_v23  ;;  %v191_v23 = vsel %vm190_vm4, %v1778_v18, 10  ;;  %v197_v18 = vsel %vm196_vm6, %v1788_v30, 10 }
 0x10e   : > { %v764_v5 = vadd.s32 42, %v191_v23 }
 0x111   : > { %690 = vperm.xlu2 %1683, %v599_v48   ;;  %v768_v48 = vadd.s32 42, %v199_v35  ;;  %v205_v35 = vsel %vm204_vm5, %v1817_v1, 10 }
 0x112   : > { %687 = vperm.xlu1 %1685, %v598_v0   ;;  %v2073_v43 = vpop.permute.xlu2 %498  ;;  %v771_v63 = vadd.s32 42, %v205_v35 }
 0x113   : > { %1687 = vset.pattern.permute.xlu0 %v1738_v44  ;;  %v2076_v19 = vpop.permute.xlu1 %468 }
 0x114   : > { %798 = vperm.xlu0 %1687, %v763_v40   ;;  %v2079_v39 = vpop.permute.xlu0 %474  ;;  %v193_v40 = vsel %vm192_vm3, %v1791_v32, 10 }
 0x115   : > { %v765_v20 = vadd.s32 42, %v193_v40  ;;  %v767_v40 = vadd.s32 42, %v197_v18 }
 0x119   : > { %1686 = vset.pattern.permute.xlu2 %v1738_v44 }
 0x11a   : > { %696 = vperm.xlu1 %1685, %v601_v24   ;;  %795 = vperm.xlu2 %1686, %v762_v56   ;;  %v195_v24 = vsel %vm194_vm7, %v1776_v15, 10  ;;  %vm220_vm7 = vcmp.lt.s32.totalorder %v1836_v29, 10 }
 0x11b   : > { %v2086_v0 = vpop.permute.xlu1 %477  ;;  %v2088_v22 = vpop.permute.xlu2 %603  ;;  %v766_v23 = vadd.s32 42, %v195_v24 }
 0x11c   : > { %813 = vperm.xlu0 %1687, %v768_v48   ;;  %v2091_v50 = vpop.permute.xlu0 %483  ;;  %v211_v48 = vsel %vm210_vm8, %v1829_v17, 10  ;;  %v201_v17 = vsel %vm200_vm10, %v1803_v47, 10  ;;  %v207_v47 = vsel %vm206_vm13, %v1815_v62, 10  ;;  %v215_v62 = vsel %vm214_vm15, %v1824_v11, 10 }
 0x11d   : > { %v769_v18 = vadd.s32 42, %v201_v17  ;;  %v772_v17 = vadd.s32 42, %v207_v47  ;;  %vm218_vm8 = vcmp.lt.s32.totalorder %v1839_v33, 10  ;;  %vm226_vm15 = vcmp.lt.s32.totalorder %v1848_v49, 10  ;;  %v2503_v47 = vld [vmem:[%s1768_s12 + $0x50] sm:$0xff] }
 0x122   : > { %1688 = vset.pattern.permute.xlu1 %v1738_v44  ;;  %804 = vperm.xlu2 %1686, %v765_v20   ;;  %v774_v44 = vadd.s32 42, %v211_v48  ;;  %v217_v20 = vsel %vm216_vm11, %v1841_v37, 10  ;;  %v120_v37 = vlaneseq }
 0x123   : > { %v2098_v56 = vpop.permute.xlu1 %486  ;;  %801 = vperm.xlu1 %1688, %v764_v5   ;;  %v2100_v32 = vpop.permute.xlu2 %612  ;;  %v777_v24 = vadd.s32 42, %v217_v20 }
 0x124   : > { %822 = vperm.xlu0 %1687, %v771_v63   ;;  %v2103_v1 = vpop.permute.xlu0 %492  ;;  %v203_v63 = vsel %vm202_vm9, %v1800_v45, 10  ;;  %vm234_vm9 = vcmp.lt.s32.totalorder %v1877_v34, 10 }
 0x125   : > { %v770_v35 = vadd.s32 42, %v203_v63 }
 0x12a   : > { %810 = vperm.xlu2 %1686, %v767_v40   ;;  %v209_v40 = vsel %vm208_vm12, %v1812_v60, 10 }
 0x12b   : > { %v2110_v5 = vpop.permute.xlu1 %495  ;;  %807 = vperm.xlu1 %1688, %v766_v23   ;;  %v2112_v30 = vpop.permute.xlu2 %618  ;;  %v773_v63 = vadd.s32 42, %v209_v40  ;;  %v229_v40 = vsel %vm228_vm1, %v1865_v9, 10  ;;  %v221_v9 = vsel %vm220_vm7, %v1836_v29, 10  ;;  %vm224_vm1 = vcmp.lt.s32.totalorder %v1851_v52, 10 }
 0x12c   : > { %831 = vperm.xlu0 %1687, %v774_v44   ;;  %v2115_v15 = vpop.permute.xlu0 %501  ;;  %v223_v44 = vsel %vm222_vm14, %v1853_v55, 10 }
 0x12d   : > { %v780_v20 = vadd.s32 42, %v223_v44  ;;  %v219_v44 = vsel %vm218_vm8, %v1839_v33, 10 }
 0x12e   : > { %v778_v29 = vadd.s32 42, %v219_v44 }
 0x132   : > { %819 = vperm.xlu2 %1686, %v770_v35   ;;  %v2132_v35 = vand.u32 127, %v120_v37  ;;  %v783_v37 = vadd.s32 42, %v229_v40 }
 0x133   : > { %v2122_v48 = vpop.permute.xlu1 %504  ;;  %816 = vperm.xlu1 %1688, %v769_v18   ;;  %v2124_v45 = vpop.permute.xlu2 %627  ;;  %v213_v18 = vsel %vm212_vm0, %v1827_v13, 10 }
 0x134   : > { %840 = vperm.xlu0 %1687, %v777_v24   ;;  %vm512_vm2 = vcmp.eq.s32.totalorder %v2132_v35, %v2030_v10  ;;  %vm352_vm3 = vcmp.eq.s32.totalorder %v2132_v35, %v1940_v61  ;;  %v776_v10 = vadd.s32 42, %v215_v62  ;;  %v775_v11 = vadd.s32 42, %v213_v18 }
 0x135   : > { %v2128_v23 = vpop.permute.xlu0 %606  ;;  %vm544_vm4 = vmor %vm352_vm3, %vm512_vm2  ;;  %vm515_vm10 = vcmp.eq.s32.totalorder %v2132_v35, %v2039_v38  ;;  %vm355_vm11 = vcmp.eq.s32.totalorder %v2132_v35, %v1949_v12  ;;  %v779_v38 = vadd.s32 42, %v221_v9  ;;  %vm523_vm0 = vcmp.eq.s32.totalorder %v2132_v35, %v2035_v36 }
 0x136   : > { %vm547_vm12 = vmor %vm355_vm11, %vm515_vm10  ;;  %vm240_vm2 = vcmp.lt.s32.totalorder %v1888_v53, 10  ;;  %vm363_vm3 = vcmp.eq.s32.totalorder %v2132_v35, %v1936_v58  ;;  %v225_v36 = vsel %vm224_vm1, %v1851_v52, 10  ;;  %vm358_vm8 = vcmp.eq.s32.totalorder %v2132_v35, %v1958_v26 }
 0x137   : > { %v3155_v58 = vmov 0  ;;  %v781_v40 = vadd.s32 42, %v225_v36  ;;  %vm246_vm1 = vcmp.lt.s32.totalorder %v1896_v2, 10 }
 0x13a   : > { %828 = vperm.xlu2 %1686, %v773_v63  }
 0x13b   : > { %825 = vperm.xlu1 %1688, %v772_v17   ;;  %v2138_v60 = vpop.permute.xlu2 %636  ;;  %v235_v17 = vsel %vm234_vm9, %v1877_v34, 10  ;;  %v227_v34 = vsel %vm226_vm15, %v1848_v49, 10  ;;  %vm526_vm15 = vcmp.eq.s32.totalorder %v2132_v35, %v2044_v31 }
 0x13c   : > { %849 = vperm.xlu0 %1687, %v780_v20   ;;  %v2141_v55 = vpop.permute.xlu1 %609  ;;  %v786_v62 = vadd.s32 42, %v235_v17  ;;  %v782_v49 = vadd.s32 42, %v227_v34  ;;  %v3172_v34 = vld [vmem:[#allocation16_spill] sm:$0xff]  ;;  %v2544_v20 = vld [vmem:[%s1768_s12 + $0x68] sm:$0xff] }
 0x13d   : > { %v622_v24 = vpop.permute.xlu0 %621 }
 0x13e   : > { %vm704_vm5 = vcmp.eq.s32.totalorder %v2132_v35, %v622_v24  ;;  %v3157_v24 = vmov 0 }
 0x13f   : > { %vm2148_vm6 = vmor %vm544_vm4, %vm704_vm5  ;;  %vm518_vm4 = vcmp.eq.s32.totalorder %v2132_v35, %v2048_v42  ;;  %v241_v42 = vsel %vm240_vm2, %v1888_v53, 10  ;;  %vm366_vm2 = vcmp.eq.s32.totalorder %v2132_v35, %v1945_v7  ;;  %v3159_v7 = vmov 0 }
 0x140   : > { %vm555_vm5 = vmor %vm363_vm3, %vm523_vm0  ;;  %v789_v52 = vadd.s32 42, %v241_v42  ;;  %vm230_vm0 = vcmp.lt.s32.totalorder %v1863_v6, 10  ;;  %vm521_vm3 = vcmp.eq.s32.totalorder %v2132_v35, %v2057_v59  ;;  %v247_v59 = vsel %vm246_vm1, %v1896_v2, 10 }
 0x141   : > { %vm550_vm10 = vmor %vm358_vm8, %vm518_vm4  ;;  %v231_v31 = vsel %vm230_vm0, %v1863_v6, 10  ;;  %v792_v6 = vadd.s32 42, %v247_v59  ;;  %vm529_vm0 = vcmp.eq.s32.totalorder %v2132_v35, %v2053_v8  ;;  %vm369_vm1 = vcmp.eq.s32.totalorder %v2132_v35, %v1954_v21 }
 0x142   : > { %837 = vperm.xlu2 %1686, %v776_v10   ;;  %vm558_vm4 = vmor %vm366_vm2, %vm526_vm15  ;;  %v784_v9 = vadd.s32 42, %v231_v31  ;;  %vm238_vm15 = vcmp.lt.s32.totalorder %v1872_v25, 10  ;;  %vm236_vm2 = vcmp.lt.s32.totalorder %v1875_v27, 10  ;;  %v3163_v21 = vmov 0  ;;  %v3182_v31 = vld [vmem:[#allocation17_spill] sm:$0xff] }
 0x143   : > { %834 = vperm.xlu1 %1688, %v775_v11   ;;  %v2157_v13 = vpop.permute.xlu2 %645  ;;  %v237_v8 = vsel %vm236_vm2, %v1875_v27, 10  ;;  %vm532_vm2 = vcmp.eq.s32.totalorder %v2132_v35, %v2062_v16  ;;  %v3174_v42 = vmov 0 }
 0x144   : > { %858 = vperm.xlu0 %1687, %v783_v37   ;;  %v2160_v61 = vpop.permute.xlu1 %615  ;;  %v3161_v37 = vmov 0  ;;  %v787_v17 = vadd.s32 42, %v237_v8  ;;  %v3191_v8 = vld [vmem:[#allocation10_spill] sm:$0xff] }
 0x145   : > { %v631_v63 = vpop.permute.xlu0 %630 }
 0x146   : > { %vm707_vm13 = vcmp.eq.s32.totalorder %v2132_v35, %v631_v63 }
 0x147   : > { %vm2167_vm14 = vmor %vm547_vm12, %vm707_vm13  ;;  %vm232_vm13 = vcmp.lt.s32.totalorder %v1860_v4, 10 }
 0x148   : > { %v233_v26 = vsel %vm232_vm13, %v1860_v4, 10 }
 0x149   : > { %v785_v4 = vadd.s32 42, %v233_v26  ;;  %v3181_v26 = vld [vmem:[#allocation8_spill] sm:$0xff] }
 0x14a   : > { %846 = vperm.xlu2 %1686, %v779_v38   ;;  %v1739_v38 = vmov 4  }
 0x14b   : > { %843 = vperm.xlu1 %1688, %v778_v29   ;;  %v655_v33 = vpop.permute.xlu2 %654 }
 0x14c   : > { %867 = vperm.xlu0 %1687, %v786_v62   ;;  %v2181_v12 = vpop.permute.xlu1 %624  ;;  %vm715_vm7 = vcmp.eq.s32.totalorder %v2132_v35, %v655_v33 }
 0x14d   : > { %v640_v18 = vpop.permute.xlu0 %639  ;;  %vm2187_vm9 = vmor %vm555_vm5, %vm715_vm7  ;;  %vm361_vm7 = vcmp.eq.s32.totalorder %v2132_v35, %v1967_v54  ;;  %v239_v54 = vsel %vm238_vm15, %v1872_v25, 10 }
 0x14e   : > { %v3156_v58 = vsel %vm2187_vm9, 4294967295, %v3155_v58  ;;  %vm710_vm11 = vcmp.eq.s32.totalorder %v2132_v35, %v640_v18  ;;  %v788_v25 = vadd.s32 42, %v239_v54  ;;  %v3189_v54 = vmov 0 }
 0x14f   : > { %vm2193_vm12 = vmor %vm550_vm10, %vm710_vm11  ;;  %vm699_vm9 = vcmp.eq.s32.totalorder %v2132_v35, %v2128_v23 }
 0x150   : > { %v3158_v24 = vsel %vm2193_vm12, 4294967295, %v3157_v24  ;;  %vm553_vm10 = vmor %vm361_vm7, %vm521_vm3  ;;  %vm524_vm3 = vcmp.eq.s32.totalorder %v2132_v35, %v2067_v28  ;;  %vm364_vm7 = vcmp.eq.s32.totalorder %v2132_v35, %v1976_v14  ;;  %v3165_v28 = vmov 0 }
 0x152   : > { %855 = vperm.xlu2 %1686, %v782_v49   ;;  %v3176_v49 = vmov 0 }
 0x153   : > { %852 = vperm.xlu1 %1688, %v781_v40   ;;  %v664_v53 = vpop.permute.xlu2 %663  ;;  %v3178_v40 = vld [vmem:[#allocation18_spill] sm:$0xff] }
 0x154   : > { %876 = vperm.xlu0 %1687, %v789_v52   ;;  %v2207_v10 = vpop.permute.xlu1 %633  ;;  %vm718_vm5 = vcmp.eq.s32.totalorder %v2132_v35, %v664_v53  ;;  %v3179_v52 = vmov 0 }
 0x155   : > { %v649_v11 = vpop.permute.xlu0 %648  ;;  %vm2213_vm8 = vmor %vm558_vm4, %vm718_vm5 }
 0x156   : > { %v3160_v7 = vsel %vm2213_vm8, 4294967295, %v3159_v7  ;;  %vm713_vm11 = vcmp.eq.s32.totalorder %v2132_v35, %v649_v11  ;;  %vm561_vm4 = vmor %vm369_vm1, %vm529_vm0  ;;  %vm244_vm0 = vcmp.lt.s32.totalorder %v1883_v46, 10  ;;  %vm242_vm1 = vcmp.lt.s32.totalorder %v1886_v51, 10  ;;  %v2326_v11 = vld [vmem:[%s1768_s12] sm:$0xff] }
 0x157   : > { %vm2219_vm13 = vmor %vm553_vm10, %vm713_vm11  ;;  %v245_v14 = vsel %vm244_vm0, %v1883_v46, 10  ;;  %v243_v16 = vsel %vm242_vm1, %v1886_v51, 10  ;;  %v3167_v46 = vmov 0  ;;  %vm535_vm1 = vcmp.eq.s32.totalorder %v2132_v35, %v2073_v43  ;;  %v3173_v43 = vld [vmem:[#allocation21_spill] sm:$0xff] }
 0x158   : > { %v3162_v37 = vsel %vm2219_vm13, 4294967295, %v3161_v37  ;;  %vm556_vm11 = vmor %vm364_vm7, %vm524_vm3  ;;  %vm372_vm3 = vcmp.eq.s32.totalorder %v2132_v35, %v1963_v41  ;;  %vm367_vm7 = vcmp.eq.s32.totalorder %v2132_v35, %v1985_v57  ;;  %v2264_v41 = vld [vmem:[%s1768_s12 + $0x8] sm:$0xff]  ;;  %v791_v33 = vadd.s32 42, %v245_v14  ;;  %v2378_v14 = vld [vmem:[%s1768_s12 + $0x10] sm:$0xff] }
 0x159   : > { %v3169_v51 = vmov 0  ;;  %v790_v57 = vadd.s32 42, %v243_v16 }
 0x15a   : > { %864 = vperm.xlu2 %1686, %v785_v4   ;;  %v2333_v4 = vld [vmem:[%s1768_s12 + $0x48] sm:$0xff] }
 0x15b   : > { %861 = vperm.xlu1 %1688, %v784_v9   ;;  %v673_v2 = vpop.permute.xlu2 %672  ;;  %v3184_v9 = vmov 0 }
 0x15c   : > { %885 = vperm.xlu0 %1687, %v792_v6   ;;  %v2232_v44 = vpop.permute.xlu1 %642  ;;  %vm721_vm5 = vcmp.eq.s32.totalorder %v2132_v35, %v673_v2  ;;  %v3186_v6 = vld [vmem:[#allocation20_spill] sm:$0xff]  ;;  %v3187_v2 = vmov 0 }
 0x15d   : > { %v658_v63 = vpop.permute.xlu0 %657  ;;  %vm2238_vm10 = vmor %vm561_vm4, %vm721_vm5  ;;  %vm527_vm4 = vcmp.eq.s32.totalorder %v2132_v35, %v2079_v39  ;;  %v3171_v39 = vld [vmem:[#allocation2_spill] sm:$0xff] }
 0x15e   : > { %v3164_v21 = vsel %vm2238_vm10, 4294967295, %v3163_v21  ;;  %vm716_vm8 = vcmp.eq.s32.totalorder %v2132_v35, %v658_v63  ;;  %vm559_vm0 = vmor %vm367_vm7, %vm527_vm4  ;;  %vm530_vm4 = vcmp.eq.s32.totalorder %v2132_v35, %v2091_v50  ;;  %vm248_vm7 = vcmp.lt.s32.totalorder %v3171_v39, 10  ;;  %v2296_v50 = vld [vmem:[%s1768_s12 + $0x30] sm:$0xff]  ;;  %v3192_v63 = vld [vmem:[#allocation19_spill] sm:$0xff] }
 0x15f   : > { %vm2243_vm15 = vmor %vm556_vm11, %vm716_vm8 }
 0x160   : > { %v3166_v28 = vsel %vm2243_vm15, 4294967295, %v3165_v28  ;;  %vm564_vm8 = vmor %vm372_vm3, %vm532_vm2 }
 0x162   : > { %873 = vperm.xlu2 %1686, %v788_v25   ;;  %v2368_v25 = vld [vmem:[%s1768_s12 + $0x18] sm:$0xff] }
 0x163   : > { %870 = vperm.xlu1 %1688, %v787_v17   ;;  %v682_v27 = vpop.permute.xlu2 %681  ;;  %v3195_v17 = vld [vmem:[#allocation27_spill] sm:$0xff] }
 0x164   : > { %1690 = vset.pattern.permute.xlu0 %v1739_v38  ;;  %v2257_v29 = vpop.permute.xlu1 %651  ;;  %vm724_vm5 = vcmp.eq.s32.totalorder %v2132_v35, %v682_v27 }
 0x165   : > { %1026 = vperm.xlu0 %1690, %v2264_v41   ;;  %v667_v62 = vpop.permute.xlu0 %666  ;;  %vm2267_vm11 = vmor %vm564_vm8, %vm724_vm5  ;;  %vm525_vm8 = vcmp.eq.s32.totalorder %v2132_v35, %v2076_v19  ;;  %vm375_vm5 = vcmp.eq.s32.totalorder %v2132_v35, %v1972_v3  ;;  %v249_v3 = vsel %vm248_vm7, %v3171_v39, 10  ;;  %vm346_vm7 = vcmp.eq.s32.totalorder %v2132_v35, %v3181_v26 }
 0x166   : > { %v3168_v46 = vsel %vm2267_vm11, 4294967295, %v3167_v46  ;;  %vm719_vm2 = vcmp.eq.s32.totalorder %v2132_v35, %v667_v62  ;;  %vm365_vm11 = vcmp.eq.s32.totalorder %v2132_v35, %v3172_v34  ;;  %v793_v53 = vadd.s32 42, %v249_v3  ;;  %v3198_v62 = vld [vmem:[#allocation23_spill] sm:$0xff]  ;;  %v3204_v34 = vld [vmem:[#allocation4_spill] sm:$0xff] }
 0x167   : > { %vm2277_vm3 = vmor %vm559_vm0, %vm719_vm2  ;;  %vm370_vm2 = vcmp.eq.s32.totalorder %v2132_v35, %v3173_v43  ;;  %v3202_v39 = vmov 0 }
 0x168   : > { %v3170_v51 = vsel %vm2277_vm3, 4294967295, %v3169_v51  ;;  %vm567_vm0 = vmor %vm375_vm5, %vm535_vm1  ;;  %vm506_vm5 = vcmp.eq.s32.totalorder %v2132_v35, %v3178_v40 }
 0x169   : > { %vm557_vm3 = vmor %vm365_vm11, %vm525_vm8 }
 0x16a   : > { %882 = vperm.xlu2 %1686, %v791_v33   ;;  %vm562_vm10 = vmor %vm370_vm2, %vm530_vm4  ;;  %v3199_v33 = vmov 0 }
 0x16b   : > { %879 = vperm.xlu1 %1688, %v790_v57   ;;  %v691_v19 = vpop.permute.xlu2 %690  ;;  %v3201_v57 = vld [vmem:[#allocation30_spill] sm:$0xff] }
 0x16c   : > { %v661_v36 = vpop.permute.xlu1 %660  ;;  %vm727_vm15 = vcmp.eq.s32.totalorder %v2132_v35, %v691_v19  ;;  %v3207_v19 = vld [vmem:[#allocation11_spill] sm:$0xff] }
 0x16d   : > { %vm717_vm13 = vcmp.eq.s32.totalorder %v2132_v35, %v661_v36  ;;  %1051 = vperm.xlu0 %1690, %v2296_v50   ;;  %v676_v18 = vpop.permute.xlu0 %675  ;;  %vm2299_vm1 = vmor %vm567_vm0, %vm727_vm15  ;;  %vm528_vm15 = vcmp.eq.s32.totalorder %v2132_v35, %v2086_v0  ;;  %v3183_v0 = vld [vmem:[#allocation24_spill] sm:$0xff]  ;;  %v3208_v36 = vld [vmem:[#allocation22_spill] sm:$0xff] }
 0x16e   : > { %v3175_v42 = vsel %vm2299_vm1, 4294967295, %v3174_v42  ;;  %vm2303_vm11 = vmor %vm557_vm3, %vm717_vm13  ;;  %vm722_vm8 = vcmp.eq.s32.totalorder %v2132_v35, %v676_v18  ;;  %vm698_vm13 = vcmp.eq.s32.totalorder %v2132_v35, %v2088_v22  ;;  %vm368_vm3 = vcmp.eq.s32.totalorder %v2132_v35, %v3182_v31  ;;  %v2425_v18 = vld [vmem:[%s1768_s12 + $0x20] sm:$0xff] }
 0x16f   : > { %v3177_v49 = vsel %vm2303_vm11, 4294967295, %v3176_v49  ;;  %vm2310_vm4 = vmor %vm562_vm10, %vm722_vm8  ;;  %vm533_vm10 = vcmp.eq.s32.totalorder %v2132_v35, %v2103_v1  ;;  %vm373_vm8 = vcmp.eq.s32.totalorder %v2132_v35, %v3183_v0  ;;  %v3213_v31 = vld [vmem:[#allocation26_spill] sm:$0xff] }
 0x170   : > { %v3180_v52 = vsel %vm2310_vm4, 4294967295, %v3179_v52  ;;  %vm538_vm0 = vmor %vm346_vm7, %vm506_vm5  ;;  %vm534_vm4 = vcmp.eq.s32.totalorder %v2132_v35, %v2110_v5  ;;  %v2421_v5 = vld [vmem:[%s1768_s12 + $0x28] sm:$0xff] }
 0x171   : > { %vm560_vm2 = vmor %vm368_vm3, %vm528_vm15 }
 0x172   : > { %1689 = vset.pattern.permute.xlu2 %v1739_v38  ;;  %vm730_vm11 = vmor %vm538_vm0, %vm698_vm13  ;;  %vm509_vm13 = vcmp.eq.s32.totalorder %v2132_v35, %v3186_v6 }
 0x173   : > { %888 = vperm.xlu1 %1688, %v793_v53   ;;  %1021 = vperm.xlu2 %1689, %v2326_v11   ;;  %vm565_vm1 = vmor %vm373_vm8, %vm533_vm10  ;;  %vm531_vm10 = vcmp.eq.s32.totalorder %v2132_v35, %v2098_v56 }
 0x174   : > { %v670_v22 = vpop.permute.xlu1 %669  ;;  %v796_v59 = vpop.permute.xlu2 %795 }
 0x175   : > { %vm720_vm5 = vcmp.eq.s32.totalorder %v2132_v35, %v670_v22  ;;  %1066 = vperm.xlu0 %1690, %v2333_v4   ;;  %v685_v1 = vpop.permute.xlu0 %684  ;;  %vm890_vm15 = vcmp.eq.s32.totalorder %v2132_v35, %v796_v59  ;;  %v3216_v22 = vld [vmem:[#allocation5_spill] sm:$0xff] }
 0x176   : > { %vm2337_vm7 = vmor %vm560_vm2, %vm720_vm5  ;;  %vm725_vm3 = vcmp.eq.s32.totalorder %v2132_v35, %v685_v1  ;;  %vm349_vm2 = vcmp.eq.s32.totalorder %v2132_v35, %v3191_v8  ;;  %vm701_vm5 = vcmp.eq.s32.totalorder %v2132_v35, %v2100_v32  ;;  %v3217_v59 = vld [vmem:[#allocation25_spill] sm:$0xff]  ;;  %v2458_v1 = vld [vmem:[%s1768_s12 + $0x40] sm:$0xff]  ;;  %v3221_v32 = vmov 0 }
 0x177   : > { %v3185_v9 = vsel %vm2337_vm7, 4294967295, %v3184_v9  ;;  %vm2344_vm0 = vmor %vm565_vm1, %vm725_vm3  ;;  %vm371_vm1 = vcmp.eq.s32.totalorder %v2132_v35, %v3192_v63  ;;  %vm536_vm7 = vcmp.eq.s32.totalorder %v2132_v35, %v2115_v15  ;;  %v2462_v8 = vld [vmem:[%s1768_s12 + $0x38] sm:$0xff]  ;;  %v2467_v63 = vld [vmem:[%s1768_s12 + $0x90] sm:$0xff] }
 0x178   : > { %v3188_v2 = vsel %vm2344_vm0, 4294967295, %v3187_v2  ;;  %vm2350_vm8 = vmor %vm730_vm11, %vm890_vm15  ;;  %vm376_vm11 = vcmp.eq.s32.totalorder %v2132_v35, %v3195_v17  ;;  %v3220_v17 = vld [vmem:[#allocation28_spill] sm:$0xff] }
 0x179   : > { %v3190_v54 = vsel %vm2350_vm8, 4294967295, %v3189_v54  ;;  %vm541_vm3 = vmor %vm349_vm2, %vm509_vm13  ;;  %vm351_vm8 = vcmp.eq.s32.totalorder %v2132_v35, %v3204_v34 }
 0x17a   : > { %vm2362_vm0 = vmor %vm371_vm1, %vm531_vm10 }
 0x17b   : > { %1691 = vset.pattern.permute.xlu1 %v1739_v38  ;;  %1036 = vperm.xlu2 %1689, %v2368_v25   ;;  %vm2373_vm15 = vmor %vm541_vm3, %vm701_vm5  ;;  %v2383_v38 = vld [vmem:[%s1768_s12 + $0x60] sm:$0xff]  ;;  %vm511_vm5 = vcmp.eq.s32.totalorder %v2132_v35, %v3198_v62  ;;  %vm507_vm3 = vcmp.eq.s32.totalorder %v2132_v35, %v3201_v57  ;;  %v3227_v62 = vld [vmem:[#allocation7_spill] sm:$0xff] }
 0x17c   : > { %v679_v27 = vpop.permute.xlu1 %678  ;;  %1031 = vperm.xlu1 %1691, %v2378_v14   ;;  %v805_v15 = vpop.permute.xlu2 %804  ;;  %vm568_vm13 = vmor %vm376_vm11, %vm536_vm7  ;;  %v2499_v57 = vld [vmem:[%s1768_s12 + $0x58] sm:$0xff] }
 0x17d   : > { %vm723_vm10 = vcmp.eq.s32.totalorder %v2132_v35, %v679_v27  ;;  %1081 = vperm.xlu0 %1690, %v2383_v38   ;;  %v694_v16 = vpop.permute.xlu0 %693  ;;  %vm893_vm2 = vcmp.eq.s32.totalorder %v2132_v35, %v805_v15  ;;  %v3223_v27 = vld [vmem:[#allocation29_spill] sm:$0xff] }
 0x17e   : > { %vm2391_vm1 = vmor %vm2362_vm0, %vm723_vm10  ;;  %vm728_vm7 = vcmp.eq.s32.totalorder %v2132_v35, %v694_v16  ;;  %vm347_vm10 = vcmp.eq.s32.totalorder %v2132_v35, %v3207_v19  ;;  %v3226_v16 = vld [vmem:[#allocation6_spill] sm:$0xff] }
 0x17f   : > { %v3200_v33 = vsel %vm2391_vm1, 4294967295, %v3199_v33  ;;  %vm2398_vm11 = vmor %vm568_vm13, %vm728_vm7  ;;  %vm703_vm7 = vcmp.eq.s32.totalorder %v2132_v35, %v2112_v30  ;;  %vm374_vm1 = vcmp.eq.s32.totalorder %v2132_v35, %v3208_v36  ;;  %v2430_v30 = vld [vmem:[%s1768_s12 + $0x78] sm:$0xff]  ;;  %v3228_v36 = vmov 0 }
 0x180   : > { %v3203_v39 = vsel %vm2398_vm11, 4294967295, %v3202_v39  ;;  %vm2408_vm0 = vmor %vm2373_vm15, %vm893_vm2 }
 0x181   : > { %vm543_vm13 = vmor %vm351_vm8, %vm511_vm5 }
 0x182   : > { %vm539_vm11 = vmor %vm347_vm10, %vm507_vm3  ;;  %vm354_vm10 = vcmp.eq.s32.totalorder %v2132_v35, %v3216_v22  ;;  %v3236_v22 = vld [vmem:[#allocation9_spill] sm:$0xff] }
 0x183   : > { %vm566_vm12 = vmor %vm374_vm1, %vm534_vm4  ;;  %1046 = vperm.xlu2 %1689, %v2421_v5  }
 0x184   : > { %vm735_vm15 = vmor %vm543_vm13, %vm703_vm7  ;;  %v688_v3 = vpop.permute.xlu1 %687  ;;  %1041 = vperm.xlu1 %1691, %v2425_v18   ;;  %v811_v40 = vpop.permute.xlu2 %810  ;;  %vm706_vm13 = vcmp.eq.s32.totalorder %v2132_v35, %v2124_v45  ;;  %vm377_vm7 = vcmp.eq.s32.totalorder %v2132_v35, %v3217_v59  ;;  %v3218_v45 = vmov 0  ;;  %v3237_v59 = vld [vmem:[#allocation3_spill] sm:$0xff] }
 0x185   : > { %vm731_vm8 = vmor %vm539_vm11, %vm699_vm9  ;;  %vm726_vm2 = vcmp.eq.s32.totalorder %v2132_v35, %v688_v3  ;;  %1096 = vperm.xlu0 %1690, %v2430_v30   ;;  %vm895_vm4 = vcmp.eq.s32.totalorder %v2132_v35, %v811_v40  ;;  %vm514_vm9 = vcmp.eq.s32.totalorder %v2132_v35, %v3213_v31  ;;  %v3230_v3 = vld [vmem:[#allocation31_spill] sm:$0xff]  ;;  %v3231_v40 = vmov 0 }
 0x186   : > { %vm2434_vm5 = vmor %vm566_vm12, %vm726_vm2  ;;  %v799_v53 = vpop.permute.xlu0 %798  ;;  %vm537_vm12 = vcmp.eq.s32.totalorder %v2132_v35, %v2122_v48 }
 0x187   : > { %vm891_vm1 = vcmp.eq.s32.totalorder %v2132_v35, %v799_v53  ;;  %vm2439_vm3 = vmor %vm735_vm15, %vm895_vm4  ;;  %v3233_v53 = vld [vmem:[#allocation32_spill] sm:$0xff] }
 0x188   : > { %vm2445_vm11 = vmor %vm731_vm8, %vm891_vm1 }
 0x189   : > { %vm546_vm15 = vmor %vm354_vm10, %vm514_vm9 }
 0x18a   : > { %vm569_vm8 = vmor %vm377_vm7, %vm537_vm12  ;;  %vm517_vm12 = vcmp.eq.s32.totalorder %v2132_v35, %v3220_v17  ;;  %vm508_vm7 = vcmp.eq.s32.totalorder %v2132_v35, %v3223_v27  ;;  %v3238_v17 = vmov 0  ;;  %v3240_v27 = vmov 0 }
 0x18b   : > { %1061 = vperm.xlu2 %1689, %v2458_v1   ;;  %vm738_vm2 = vmor %vm546_vm15, %vm706_vm13 }
 0x18c   : > { %v697_v6 = vpop.permute.xlu1 %696  ;;  %1056 = vperm.xlu1 %1691, %v2462_v8   ;;  %v820_v48 = vpop.permute.xlu2 %819 }
 0x18d   : > { %vm729_vm4 = vcmp.eq.s32.totalorder %v2132_v35, %v697_v6  ;;  %1111 = vperm.xlu0 %1690, %v2467_v63   ;;  %vm898_vm1 = vcmp.eq.s32.totalorder %v2132_v35, %v820_v48  ;;  %v2540_v6 = vld [vmem:[%s1768_s12 + $0x70] sm:$0xff] }
 0x18e   : > { %vm2471_vm9 = vmor %vm569_vm8, %vm729_vm4  ;;  %v814_v56 = vpop.permute.xlu0 %813  ;;  %vm357_vm8 = vcmp.eq.s32.totalorder %v2132_v35, %v3226_v16  ;;  %vm709_vm4 = vcmp.eq.s32.totalorder %v2132_v35, %v2138_v60  ;;  %v2507_v60 = vld [vmem:[%s1768_s12 + $0xa8] sm:$0xff]  ;;  %v3243_v16 = vmov 0 }
 0x18f   : > { %v3219_v45 = vsel %vm2471_vm9, 4294967295, %v3218_v45  ;;  %vm896_vm10 = vcmp.eq.s32.totalorder %v2132_v35, %v814_v56  ;;  %vm2478_vm13 = vmor %vm738_vm2, %vm898_vm1  ;;  %vm348_vm2 = vcmp.eq.s32.totalorder %v2132_v35, %v3227_v62  ;;  %vm700_vm1 = vcmp.eq.s32.totalorder %v2132_v35, %v2141_v55  ;;  %v3245_v62 = vld [vmem:[#allocation33_spill] sm:$0xff] }
 0x190   : > { %v3222_v32 = vsel %vm2478_vm13, 4294967295, %v3221_v32  ;;  %vm2486_vm15 = vmor %vm2148_vm6, %vm896_vm10 }
 0x191   : > { %vm549_vm9 = vmor %vm357_vm8, %vm517_vm12 }
 0x192   : > { %vm540_vm13 = vmor %vm348_vm2, %vm508_vm7  ;;  %vm510_vm2 = vcmp.eq.s32.totalorder %v2132_v35, %v3233_v53 }
 0x193   : > { %1076 = vperm.xlu2 %1689, %v2499_v57   ;;  %vm741_vm6 = vmor %vm549_vm9, %vm709_vm4  ;;  %vm520_vm9 = vcmp.eq.s32.totalorder %v2132_v35, %v3230_v3  ;;  %v2583_v3 = vld [vmem:[%s1768_s12 + $0xd8] sm:$0xff] }
 0x194   : > { %1071 = vperm.xlu1 %1691, %v2503_v47   ;;  %v829_v34 = vpop.permute.xlu2 %828  ;;  %vm732_vm10 = vmor %vm540_vm13, %vm700_vm1 }
 0x195   : > { %1126 = vperm.xlu0 %1690, %v2507_v60   ;;  %v802_v19 = vpop.permute.xlu1 %801  ;;  %vm901_vm12 = vcmp.eq.s32.totalorder %v2132_v35, %v829_v34  ;;  %v3246_v34 = vld [vmem:[#allocation12_spill] sm:$0xff] }
 0x196   : > { %vm892_vm7 = vcmp.eq.s32.totalorder %v2132_v35, %v802_v19  ;;  %v823_v55 = vpop.permute.xlu0 %822  ;;  %vm2512_vm8 = vmor %vm741_vm6, %vm901_vm12  ;;  %vm360_vm6 = vcmp.eq.s32.totalorder %v2132_v35, %v3236_v22  ;;  %vm350_vm12 = vcmp.eq.s32.totalorder %v2132_v35, %v3237_v59  ;;  %v2575_v19 = vld [vmem:[%s1768_s12 + $0x88] sm:$0xff]  ;;  %v3248_v22 = vmov 0 }
 0x197   : > { %v3229_v36 = vsel %vm2512_vm8, 4294967295, %v3228_v36  ;;  %vm2518_vm13 = vmor %vm732_vm10, %vm892_vm7  ;;  %vm899_vm4 = vcmp.eq.s32.totalorder %v2132_v35, %v823_v55  ;;  %vm712_vm10 = vcmp.eq.s32.totalorder %v2132_v35, %v2157_v13  ;;  %vm702_vm7 = vcmp.eq.s32.totalorder %v2132_v35, %v2160_v61  ;;  %v2548_v13 = vld [vmem:[%s1768_s12 + $0xc0] sm:$0xff] }
 0x198   : > { %v3232_v40 = vsel %vm2518_vm13, 4294967295, %v3231_v40  ;;  %vm2527_vm1 = vmor %vm2167_vm14, %vm899_vm4  ;;  %v2579_v55 = vld [vmem:[%s1768_s12 + $0x80] sm:$0xff]  ;;  %v3250_v59 = vmov 0 }
 0x199   : > { %vm552_vm13 = vmor %vm360_vm6, %vm520_vm9 }
 0x19a   : > { %vm542_vm8 = vmor %vm350_vm12, %vm510_vm2 }
 0x19b   : > { %1091 = vperm.xlu2 %1689, %v2540_v6   ;;  %vm744_vm14 = vmor %vm552_vm13, %vm712_vm10  ;;  %vm3242_vm10 = vnez %v3158_v24 }
 0x19c   : > { %1086 = vperm.xlu1 %1691, %v2544_v20   ;;  %v838_v48 = vpop.permute.xlu2 %837  ;;  %vm734_vm4 = vmor %vm542_vm8, %vm702_vm7  ;;  %vm513_vm7 = vcmp.eq.s32.totalorder %v2132_v35, %v3245_v62  ;;  %v2616_v62 = vld [vmem:[%s1768_s12 + $0x98] sm:$0xff] }
 0x19d   : > { %1141 = vperm.xlu0 %1690, %v2548_v13   ;;  %v808_v61 = vpop.permute.xlu1 %807  ;;  %vm904_vm9 = vcmp.eq.s32.totalorder %v2132_v35, %v838_v48  ;;  %v3253_v48 = vmov 0 }
 0x19e   : > { %vm894_vm2 = vcmp.eq.s32.totalorder %v2132_v35, %v808_v61  ;;  %v832_v56 = vpop.permute.xlu0 %831  ;;  %vm2553_vm13 = vmor %vm744_vm14, %vm904_vm9  ;;  %vm705_vm14 = vcmp.eq.s32.totalorder %v2132_v35, %v2181_v12  ;;  %v3255_v61 = vld [vmem:[#allocation34_spill] sm:$0xff] }
 0x19f   : > { %v3239_v17 = vsel %vm2553_vm13, 4294967295, %v3238_v17  ;;  %vm2557_vm6 = vmor %vm734_vm4, %vm894_vm2  ;;  %vm902_vm8 = vcmp.eq.s32.totalorder %v2132_v35, %v832_v56  ;;  %vm353_vm4 = vcmp.eq.s32.totalorder %v2132_v35, %v3246_v34  ;;  %v2612_v56 = vld [vmem:[%s1768_s12 + $0xa0] sm:$0xff]  ;;  %v2620_v34 = vld [vmem:[%s1768_s12 + $0xf0] sm:$0xff] }
 0x1a0   : > { %v3241_v27 = vsel %vm2557_vm6, 4294967295, %v3240_v27  ;;  %vm2564_vm12 = vmor %vm3242_vm10, %vm902_vm8 }
 0x1a1   : > { %v3244_v16 = vsel %vm2564_vm12, 4294967295, %v3243_v16  ;;  %vm545_vm9 = vmor %vm353_vm4, %vm513_vm7  ;;  %vm3247_vm7 = vnez %v3156_v58  ;;  %vm516_vm12 = vcmp.eq.s32.totalorder %v2132_v35, %v3255_v61  ;;  %v3256_v58 = vld [vmem:[#allocation13_spill] sm:$0xff]  ;;  %v3263_v61 = vmov 0 }
 0x1a2   : > { %vm737_vm2 = vmor %vm545_vm9, %vm705_vm14  ;;  %vm3252_vm9 = vnez %v3162_v37 }
 0x1a3   : > { %1106 = vperm.xlu2 %1689, %v2575_v19  }
 0x1a4   : > { %1101 = vperm.xlu1 %1691, %v2579_v55   ;;  %v847_v24 = vpop.permute.xlu2 %846 }
 0x1a5   : > { %1156 = vperm.xlu0 %1690, %v2583_v3   ;;  %v817_v12 = vpop.permute.xlu1 %816  ;;  %vm907_vm8 = vcmp.eq.s32.totalorder %v2132_v35, %v847_v24 }
 0x1a6   : > { %vm897_vm10 = vcmp.eq.s32.totalorder %v2132_v35, %v817_v12  ;;  %v841_v53 = vpop.permute.xlu0 %840  ;;  %vm2590_vm4 = vmor %vm3247_vm7, %vm907_vm8  ;;  %vm708_vm8 = vcmp.eq.s32.totalorder %v2132_v35, %v2207_v10  ;;  %v3258_v12 = vmov 0 }
 0x1a7   : > { %v3249_v22 = vsel %vm2590_vm4, 4294967295, %v3248_v22  ;;  %vm2594_vm6 = vmor %vm737_vm2, %vm897_vm10  ;;  %vm905_vm14 = vcmp.eq.s32.totalorder %v2132_v35, %v841_v53  ;;  %vm356_vm2 = vcmp.eq.s32.totalorder %v2132_v35, %v3256_v58  ;;  %v3260_v53 = vmov 0  ;;  %v3265_v58 = vld [vmem:[#allocation35_spill] sm:$0xff] }
 0x1a8   : > { %v3251_v59 = vsel %vm2594_vm6, 4294967295, %v3250_v59  ;;  %vm2601_vm13 = vmor %vm3252_vm9, %vm905_vm14 }
 0x1a9   : > { %v3254_v48 = vsel %vm2601_vm13, 4294967295, %v3253_v48  ;;  %vm548_vm10 = vmor %vm356_vm2, %vm516_vm12  ;;  %vm3257_vm12 = vnez %v3160_v7  ;;  %vm519_vm13 = vcmp.eq.s32.totalorder %v2132_v35, %v3265_v58  ;;  %v3266_v7 = vld [vmem:[#allocation14_spill] sm:$0xff] }
 0x1aa   : > { %vm740_vm7 = vmor %vm548_vm10, %vm708_vm8  ;;  %vm3262_vm10 = vnez %v3166_v28 }
 0x1ab   : > { %1121 = vperm.xlu2 %1689, %v2612_v56  }
 0x1ac   : > { %1116 = vperm.xlu1 %1691, %v2616_v62   ;;  %v856_v37 = vpop.permute.xlu2 %855 }
 0x1ad   : > { %1171 = vperm.xlu0 %1690, %v2620_v34   ;;  %v826_v10 = vpop.permute.xlu1 %825  ;;  %vm910_vm14 = vcmp.eq.s32.totalorder %v2132_v35, %v856_v37  ;;  %v2649_v37 = vld [vmem:[%s1768_s12 + $0xb8] sm:$0xff] }
 0x1ae   : > { %vm900_vm9 = vcmp.eq.s32.totalorder %v2132_v35, %v826_v10  ;;  %v850_v24 = vpop.permute.xlu0 %849  ;;  %vm2627_vm2 = vmor %vm3257_vm12, %vm910_vm14  ;;  %vm711_vm14 = vcmp.eq.s32.totalorder %v2132_v35, %v2232_v44  ;;  %v2653_v10 = vld [vmem:[%s1768_s12 + $0xb0] sm:$0xff] }
 0x1af   : > { %v3259_v12 = vsel %vm2627_vm2, 4294967295, %v3258_v12  ;;  %vm2631_vm6 = vmor %vm740_vm7, %vm900_vm9  ;;  %vm908_vm8 = vcmp.eq.s32.totalorder %v2132_v35, %v850_v24  ;;  %vm359_vm7 = vcmp.eq.s32.totalorder %v2132_v35, %v3266_v7  ;;  %3267 = vst [vmem:[#allocation2_spill] sm:$0xff] %v2653_v10  ;;  %v1740_v24 = vmov 5  }
 0x1b0   : > { %v3261_v53 = vsel %vm2631_vm6, 4294967295, %v3260_v53  ;;  %vm2638_vm4 = vmor %vm3262_vm10, %vm908_vm8  ;;  %v3269_v7 = vmov 0 }
 0x1b1   : > { %v3264_v61 = vsel %vm2638_vm4, 4294967295, %v3263_v61  ;;  %vm551_vm9 = vmor %vm359_vm7, %vm519_vm13  ;;  %vm3268_vm13 = vnez %v3164_v21  ;;  %v3277_v21 = vld [vmem:[#allocation15_spill] sm:$0xff] }
 0x1b2   : > { %vm743_vm12 = vmor %vm551_vm9, %vm711_vm14  ;;  %vm3273_vm9 = vnez %v3170_v51  ;;  %v2687_v51 = vld [vmem:[%s1768_s12 + $0xc8] sm:$0xff] }
 0x1b3   : > { %1136 = vperm.xlu2 %1689, %v2649_v37   ;;  %3279 = vst [vmem:[#allocation21_spill] sm:$0xff] %v2687_v51 }
 0x1b4   : > { %1131 = vperm.xlu1 %1691, %v2653_v10   ;;  %v865_v28 = vpop.permute.xlu2 %864  ;;  %v3271_v10 = vmov 0 }
 0x1b5   : > { %1693 = vset.pattern.permute.xlu0 %v1740_v24  ;;  %v835_v58 = vpop.permute.xlu1 %834  ;;  %vm913_vm8 = vcmp.eq.s32.totalorder %v2132_v35, %v865_v28 }
 0x1b6   : > { %vm903_vm10 = vcmp.eq.s32.totalorder %v2132_v35, %v835_v58  ;;  %1216 = vperm.xlu0 %1693, %v2264_v41   ;;  %v859_v44 = vpop.permute.xlu0 %858  ;;  %vm2661_vm7 = vmor %vm3268_vm13, %vm913_vm8  ;;  %v3276_v41 = vld [vmem:[#allocation36_spill] sm:$0xff]  ;;  %vm714_vm8 = vcmp.eq.s32.totalorder %v2132_v35, %v2257_v29 }
 0x1b7   : > { %v3270_v7 = vsel %vm2661_vm7, 4294967295, %v3269_v7  ;;  %vm2665_vm6 = vmor %vm743_vm12, %vm903_vm10  ;;  %vm911_vm14 = vcmp.eq.s32.totalorder %v2132_v35, %v859_v44  ;;  %vm522_vm4 = vcmp.eq.s32.totalorder %v2132_v35, %v3276_v41  ;;  %vm362_vm12 = vcmp.eq.s32.totalorder %v2132_v35, %v3277_v21  ;;  %v2683_v58 = vld [vmem:[%s1768_s12 + $0xd0] sm:$0xff] }
 0x1b8   : > { %v3272_v10 = vsel %vm2665_vm6, 4294967295, %v3271_v10  ;;  %vm2672_vm2 = vmor %vm3273_vm9, %vm911_vm14  ;;  %3278 = vst [vmem:[#allocation16_spill] sm:$0xff] %v2683_v58  ;;  %vm3280_vm6 = vnez %v3168_v46  ;;  %v3281_v21 = vmov 0  ;;  %v2715_v46 = vld [vmem:[%s1768_s12 + $0xe0] sm:$0xff] }
 0x1b9   : > { %vm554_vm10 = vmor %vm362_vm12, %vm522_vm4  ;;  %vm3285_vm12 = vnez %v3180_v52 }
 0x1ba   : > { %vm746_vm13 = vmor %vm554_vm10, %vm714_vm8 }
 0x1bb   : > { %1151 = vperm.xlu2 %1689, %v2683_v58   ;;  %v3283_v58 = vmov 0 }
 0x1bc   : > { %1146 = vperm.xlu1 %1691, %v2687_v51   ;;  %v874_v44 = vpop.permute.xlu2 %873 }
 0x1bd   : > { %v844_v41 = vpop.permute.xlu1 %843  ;;  %vm916_vm14 = vcmp.eq.s32.totalorder %v2132_v35, %v874_v44  ;;  %v3286_v44 = vmov 0 }
 0x1be   : > { %vm906_vm9 = vcmp.eq.s32.totalorder %v2132_v35, %v844_v41  ;;  %1236 = vperm.xlu0 %1693, %v2296_v50   ;;  %v868_v29 = vpop.permute.xlu0 %867  ;;  %vm2695_vm7 = vmor %vm3280_vm6, %vm916_vm14  ;;  %v2711_v50 = vld [vmem:[%s1768_s12 + $0xe8] sm:$0xff]  ;;  %vm3289_vm14 = vnez %v3175_v42  ;;  %v2742_v42 = vld [vmem:[%s1768_s12 + $0xf8] sm:$0xff] }
 0x1bf   : > { %v3282_v21 = vsel %vm2695_vm7, 4294967295, %v3281_v21  ;;  %vm2699_vm4 = vmor %vm746_vm13, %vm906_vm9  ;;  %vm914_vm8 = vcmp.eq.s32.totalorder %v2132_v35, %v868_v29  ;;  %3288 = vst [vmem:[#allocation18_spill] sm:$0xff] %v2711_v50  ;;  %vm3296_vm7 = vnez %v3188_v2 }
 0x1c0   : > { %v3284_v58 = vsel %vm2699_vm4, 4294967295, %v3283_v58  ;;  %vm2706_vm10 = vmor %vm3285_vm12, %vm914_vm8  ;;  %vm3292_vm8 = vnez %v3177_v49  ;;  %v1741_v49 = vmov 0.0  }
 0x1c1   : > { %v3287_v44 = vsel %vm2706_vm10, 4294967295, %v3286_v44 }
 0x1c3   : > { %1166 = vperm.xlu2 %1689, %v2711_v50   ;;  %v3293_v50 = vmov 0 }
 0x1c4   : > { %1161 = vperm.xlu1 %1691, %v2715_v46   ;;  %v883_v41 = vpop.permute.xlu2 %882 }
 0x1c5   : > { %v853_v51 = vpop.permute.xlu1 %852  ;;  %vm919_vm6 = vcmp.eq.s32.totalorder %v2132_v35, %v883_v41 }
 0x1c6   : > { %vm909_vm13 = vcmp.eq.s32.totalorder %v2132_v35, %v853_v51  ;;  %1248 = vperm.xlu0 %1693, %v2333_v4   ;;  %v877_v52 = vpop.permute.xlu0 %876  ;;  %vm2723_vm9 = vmor %vm3289_vm14, %vm919_vm6  ;;  %vm954_vm6 = vcmp.eq.s32.totalorder %v2132_v35, 53 }
 0x1c7   : > { %vm2729_vm12 = vmor %vm3292_vm8, %vm909_vm13  ;;  %vm917_vm4 = vcmp.eq.s32.totalorder %v2132_v35, %v877_v52  ;;  %vm3299_vm13 = vnez %v3190_v54 }
 0x1c8   : > { %v3294_v50 = vsel %vm2729_vm12, 4294967295, %v3293_v50  ;;  %vm2736_vm10 = vmor %vm3296_vm7, %vm917_vm4  ;;  %v1468_v4 = vsel %vm3299_vm13, 1.0, %v1741_v49  ;;  %vm3300_vm4 = vnez %v3185_v9  ;;  %vm3303_vm13 = vnez %v3203_v39 }
 0x1c9   : > { %3295 = vst [vmem:[#allocation8_spill] sm:$0xff] %v3294_v50 }
 0x1cb   : > { %1692 = vset.pattern.permute.xlu2 %v1740_v24 }
 0x1cc   : > { %1176 = vperm.xlu1 %1691, %v2742_v42   ;;  %1212 = vperm.xlu2 %1692, %v2326_v11  }
 0x1cd   : > { %v862_v41 = vpop.permute.xlu1 %861  ;;  %v1022_v2 = vpop.permute.xlu2 %1021 }
 0x1ce   : > { %vm912_vm7 = vcmp.eq.s32.totalorder %v2132_v35, %v862_v41  ;;  %1260 = vperm.xlu0 %1693, %v2383_v38   ;;  %v886_v52 = vpop.permute.xlu0 %885  ;;  %v2753_v50 = vsel %vm954_vm6, %v1022_v2, %v1468_v4  ;;  %v1471_v38 = vsel %vm2408_vm0, 1.0, %v1741_v49 }
 0x1cf   : > { %vm2757_vm14 = vmor %vm3300_vm4, %vm912_vm7  ;;  %vm920_vm8 = vcmp.eq.s32.totalorder %v2132_v35, %v886_v52  ;;  %vm3306_vm4 = vnez %v3200_v33 }
 0x1d0   : > { %vm2764_vm12 = vmor %vm3303_vm13, %vm920_vm8 }
 0x1d4   : > { %1694 = vset.pattern.permute.xlu1 %v1740_v24  ;;  %1224 = vperm.xlu2 %1692, %v2368_v25   ;;  %v1469_v25 = vsel %vm2445_vm11, 1.0, %v1741_v49 }
 0x1d5   : > { %1220 = vperm.xlu1 %1694, %v2378_v14   ;;  %v871_v9 = vpop.permute.xlu1 %870  ;;  %v1037_v4 = vpop.permute.xlu2 %1036 }
 0x1d6   : > { %vm915_vm7 = vcmp.eq.s32.totalorder %v2132_v35, %v871_v9  ;;  %1272 = vperm.xlu0 %1693, %v2430_v30   ;;  %v2777_v39 = vsel %vm954_vm6, %v1037_v4, %v1471_v38  ;;  %v1473_v30 = vsel %vm2439_vm3, 1.0, %v1741_v49  ;;  %vm3311_vm3 = vnez %v3222_v32 }
 0x1d7   : > { %vm2784_vm8 = vmor %vm3306_vm4, %vm915_vm7  ;;  %v1027_v14 = vpop.permute.xlu0 %1026  ;;  %vm3315_vm7 = vnez %v3229_v36  ;;  %vm3317_vm4 = vnez %v3244_v16 }
 0x1d8   : > { %v2790_v24 = vsel %vm954_vm6, %v1027_v14, %v1469_v25 }
 0x1dc   : > { %1232 = vperm.xlu2 %1692, %v2421_v5   ;;  %v1474_v5 = vsel %vm2486_vm15, 1.0, %v1741_v49  ;;  %vm3312_vm15 = vnez %v3219_v45 }
 0x1dd   : > { %1228 = vperm.xlu1 %1694, %v2425_v18   ;;  %v880_v0 = vpop.permute.xlu1 %879  ;;  %v1047_v41 = vpop.permute.xlu2 %1046 }
 0x1de   : > { %vm918_vm0 = vcmp.eq.s32.totalorder %v2132_v35, %v880_v0  ;;  %1284 = vperm.xlu0 %1693, %v2467_v63   ;;  %v2801_v33 = vsel %vm954_vm6, %v1047_v41, %v1473_v30  ;;  %v1476_v63 = vsel %vm3311_vm3, 1.0, %v1741_v49  ;;  %vm3319_vm3 = vnez %v3241_v27 }
 0x1df   : > { %vm2808_vm11 = vmor %vm2434_vm5, %vm918_vm0  ;;  %v1052_v18 = vpop.permute.xlu0 %1051  ;;  %vm3318_vm0 = vnez %v3239_v17  ;;  %v1472_v16 = vsel %vm3319_vm3, 1.0, %v1741_v49  ;;  %vm3326_vm3 = vnez %v3270_v7 }
 0x1e0   : > { %v2814_v2 = vsel %vm954_vm6, %v1052_v18, %v1474_v5  ;;  %v1496_v43 = vsel %vm2808_vm11, 1.0, %v1741_v49 }
 0x1e4   : > { %1244 = vperm.xlu2 %1692, %v2458_v1   ;;  %v1477_v1 = vsel %vm2527_vm1, 1.0, %v1741_v49  ;;  %vm3316_vm1 = vnez %v3232_v40 }
 0x1e5   : > { %1240 = vperm.xlu1 %1694, %v2462_v8   ;;  %v889_v15 = vpop.permute.xlu1 %888  ;;  %v1062_v52 = vpop.permute.xlu2 %1061  ;;  %v1470_v45 = vsel %vm3316_vm1, 1.0, %v1741_v49  ;;  %vm3323_vm1 = vnez %v3264_v61 }
 0x1e6   : > { %vm921_vm5 = vcmp.eq.s32.totalorder %v2132_v35, %v889_v15  ;;  %1296 = vperm.xlu0 %1693, %v2507_v60   ;;  %v2825_v23 = vsel %vm954_vm6, %v1062_v52, %v1476_v63  ;;  %v1479_v60 = vsel %vm3315_vm7, 1.0, %v1741_v49  ;;  %vm3322_vm7 = vnez %v3251_v59 }
 0x1e7   : > { %vm2832_vm13 = vmor %vm3312_vm15, %vm921_vm5  ;;  %v1067_v8 = vpop.permute.xlu0 %1066  ;;  %vm3320_vm5 = vnez %v3254_v48  ;;  %vm3321_vm15 = vnez %v3249_v22  ;;  %v1475_v48 = vsel %vm3322_vm7, 1.0, %v1741_v49  ;;  %vm3333_vm7 = vnez %v3284_v58  ;;  %v3334_v58 = vld [vmem:[#allocation18_spill] sm:$0xff] }
 0x1e8   : > { %v2838_v38 = vsel %vm954_vm6, %v1067_v8, %v1477_v1  ;;  %v3327_v1 = vld [vmem:[#allocation2_spill] sm:$0xff]  ;;  %v1499_v26 = vsel %vm2832_vm13, 1.0, %v1741_v49 }
 0x1ec   : > { %1256 = vperm.xlu2 %1692, %v2499_v57   ;;  %v1480_v57 = vsel %vm3317_vm4, 1.0, %v1741_v49  ;;  %vm3324_vm4 = vnez %v3259_v12 }
 0x1ed   : > { %1252 = vperm.xlu1 %1694, %v2503_v47   ;;  %v1077_v31 = vpop.permute.xlu2 %1076 }
 0x1ee   : > { %1308 = vperm.xlu0 %1693, %v2548_v13   ;;  %v1032_v9 = vpop.permute.xlu1 %1031  ;;  %v2851_v4 = vsel %vm954_vm6, %v1077_v31, %v1479_v60  ;;  %v1482_v13 = vsel %vm3318_vm0, 1.0, %v1741_v49  ;;  %vm3325_vm0 = vnez %v3261_v53  ;;  %v1491_v53 = vsel %vm3326_vm3, 1.0, %v1741_v49 }
 0x1ef   : > { %v1082_v36 = vpop.permute.xlu0 %1081  ;;  %v2858_v47 = vsel %vm954_vm6, %v1032_v9, %v1470_v45  ;;  %v1478_v61 = vsel %vm3325_vm0, 1.0, %v1741_v49 }
 0x1f0   : > { %v2862_v40 = vsel %vm954_vm6, %v1082_v36, %v1480_v57  ;;  %v3332_v36 = vld [vmem:[#allocation21_spill] sm:$0xff] }
 0x1f4   : > { %1268 = vperm.xlu2 %1692, %v2540_v6   ;;  %v1483_v6 = vsel %vm3320_vm5, 1.0, %v1741_v49  ;;  %vm3329_vm5 = vnez %v3287_v44  ;;  %v1484_v44 = vsel %vm3333_vm7, 1.0, %v1741_v49 }
 0x1f5   : > { %1264 = vperm.xlu1 %1694, %v2544_v20   ;;  %v1092_v25 = vpop.permute.xlu2 %1091 }
 0x1f6   : > { %1320 = vperm.xlu0 %1693, %v2583_v3   ;;  %v1042_v14 = vpop.permute.xlu1 %1041  ;;  %v2875_v30 = vsel %vm954_vm6, %v1092_v25, %v1482_v13  ;;  %v1485_v3 = vsel %vm3321_vm15, 1.0, %v1741_v49  ;;  %vm3331_vm15 = vnez %v3282_v21 }
 0x1f7   : > { %v1097_v17 = vpop.permute.xlu0 %1096  ;;  %v2882_v20 = vsel %vm954_vm6, %v1042_v14, %v1472_v16  ;;  %v1494_v57 = vsel %vm3331_vm15, 1.0, %v1741_v49  ;;  %v1495_v14 = vsel %vm2736_vm10, 1.0, %v1741_v49 }
 0x1f8   : > { %v2886_v27 = vsel %vm954_vm6, %v1097_v17, %v1483_v6 }
 0x1fc   : > { %1280 = vperm.xlu2 %1692, %v2575_v19   ;;  %v1486_v19 = vsel %vm3323_vm1, 1.0, %v1741_v49 }
 0x1fd   : > { %1276 = vperm.xlu1 %1694, %v2579_v55   ;;  %v1107_v0 = vpop.permute.xlu2 %1106 }
 0x1fe   : > { %1332 = vperm.xlu0 %1693, %v2620_v34   ;;  %v1057_v41 = vpop.permute.xlu1 %1056  ;;  %v2899_v5 = vsel %vm954_vm6, %v1107_v0, %v1485_v3  ;;  %v1488_v34 = vsel %vm3324_vm4, 1.0, %v1741_v49  ;;  %v1497_v3 = vsel %vm2723_vm9, 1.0, %v1741_v49  ;;  %v3335_v0 = vld [vmem:[#allocation8_spill] sm:$0xff] }
 0x1ff   : > { %v1112_v22 = vpop.permute.xlu0 %1111  ;;  %v2906_v55 = vsel %vm954_vm6, %v1057_v41, %v1475_v48  ;;  %vm3336_vm10 = vnez %v3335_v0 }
 0x200   : > { %v2910_v59 = vsel %vm954_vm6, %v1112_v22, %v1486_v19  ;;  %v1487_v48 = vsel %vm3336_vm10, 1.0, %v1741_v49  ;;  %v1498_v22 = vsel %vm2764_vm12, 1.0, %v1741_v49 }
 0x204   : > { %1292 = vperm.xlu2 %1692, %v2612_v56   ;;  %v1489_v56 = vsel %vm2672_vm2, 1.0, %v1741_v49  ;;  %vm3328_vm2 = vnez %v3272_v10  ;;  %v3330_v10 = vld [vmem:[#allocation16_spill] sm:$0xff] }
 0x205   : > { %1288 = vperm.xlu1 %1694, %v2616_v62   ;;  %v1122_v18 = vpop.permute.xlu2 %1121  ;;  %v1481_v28 = vsel %vm3328_vm2, 1.0, %v1741_v49 }
 0x206   : > { %v1072_v63 = vpop.permute.xlu1 %1071  ;;  %v2922_v15 = vsel %vm954_vm6, %v1122_v18, %v1488_v34  ;;  %v1490_v18 = vsel %vm2757_vm14, 1.0, %v1741_v49 }
 0x207   : > { %v1127_v52 = vpop.permute.xlu0 %1126  ;;  %v2929_v12 = vsel %vm954_vm6, %v1072_v63, %v1478_v61 }
 0x208   : > { %v2933_v62 = vsel %vm954_vm6, %v1127_v52, %v1489_v56  ;;  %v1493_v52 = vsel %vm2784_vm8, 1.0, %v1741_v49 }
 0x20c   : > { %1304 = vperm.xlu2 %1692, %v2649_v37   ;;  %v1492_v37 = vsel %vm3329_vm5, 1.0, %v1741_v49 }
 0x20d   : > { %1300 = vperm.xlu1 %1694, %v3327_v1   ;;  %v1137_v8 = vpop.permute.xlu2 %1136 }
 0x20e   : > { %v1087_v60 = vpop.permute.xlu1 %1086  ;;  %v2945_v31 = vsel %vm954_vm6, %v1137_v8, %v1491_v53 }
 0x20f   : > { %v1142_v45 = vpop.permute.xlu0 %1141  ;;  %v2952_v7 = vsel %vm954_vm6, %v1087_v60, %v1481_v28 }
 0x210   : > { %v2956_v9 = vsel %vm954_vm6, %v1142_v45, %v1492_v37 }
 0x214   : > { %1316 = vperm.xlu2 %1692, %v3330_v10  }
 0x215   : > { %1312 = vperm.xlu1 %1694, %v3332_v36   ;;  %v1152_v13 = vpop.permute.xlu2 %1151 }
 0x216   : > { %v1102_v25 = vpop.permute.xlu1 %1101  ;;  %v2968_v16 = vsel %vm954_vm6, %v1152_v13, %v1494_v57 }
 0x217   : > { %v1157_v6 = vpop.permute.xlu0 %1156  ;;  %v2975_v21 = vsel %vm954_vm6, %v1102_v25, %v1484_v44 }
 0x218   : > { %v2979_v17 = vsel %vm954_vm6, %v1157_v6, %v1495_v14 }
 0x21c   : > { %1328 = vperm.xlu2 %1692, %v3334_v58  }
 0x21d   : > { %1324 = vperm.xlu1 %1694, %v2715_v46   ;;  %v1167_v51 = vpop.permute.xlu2 %1166 }
 0x21e   : > { %v1117_v41 = vpop.permute.xlu1 %1116  ;;  %v2991_v19 = vsel %vm954_vm6, %v1167_v51, %v1497_v3 }
 0x21f   : > { %v1172_v34 = vpop.permute.xlu0 %1171  ;;  %v2998_v29 = vsel %vm954_vm6, %v1117_v41, %v1487_v48 }
 0x220   : > { %v3002_v46 = vsel %vm954_vm6, %v1172_v34, %v1498_v22 }
 0x225   : > { %1336 = vperm.xlu1 %1694, %v2742_v42  }
 0x226   : > { %v1132_v61 = vpop.permute.xlu1 %1131  ;;  %v1213_v54 = vpop.permute.xlu2 %1212 }
 0x227   : > { %v1339_v63 = vmul.f32 %v1213_v54, %v2753_v50  ;;  %v3018_v42 = vsel %vm954_vm6, %v1132_v61, %v1490_v18 }
 0x228   : > { %v1217_v11 = vpop.permute.xlu0 %1216 }
 0x229   : > { %v1340_v56 = vmul.f32 %v1217_v11, %v2790_v24  ;;  %1371 = vst [vmem:[%s3013_s15] sm:$0xff] %v1339_v63 }
 0x22b   : > { %1372 = vst [vmem:[%s3013_s15 + $0x8] sm:$0xff] %v1340_v56 }
 0x22e   : > { %v1147_v53 = vpop.permute.xlu1 %1146  ;;  %v1225_v1 = vpop.permute.xlu2 %1224 }
 0x22f   : > { %v1342_v8 = vmul.f32 %v1225_v1, %v2777_v39  ;;  %v3029_v50 = vsel %vm954_vm6, %v1147_v53, %v1493_v52 }
 0x230   : > { %v1237_v28 = vpop.permute.xlu0 %1236 }
 0x231   : > { %v1345_v60 = vmul.f32 %v1237_v28, %v2814_v2  ;;  %1374 = vst [vmem:[%s3013_s15 + $0x18] sm:$0xff] %v1342_v8 }
 0x233   : > { %1377 = vst [vmem:[%s3013_s15 + $0x30] sm:$0xff] %v1345_v60 }
 0x236   : > { %v1162_v24 = vpop.permute.xlu1 %1161  ;;  %v1233_v37 = vpop.permute.xlu2 %1232 }
 0x237   : > { %v1344_v45 = vmul.f32 %v1233_v37, %v2801_v33  ;;  %v3040_v39 = vsel %vm954_vm6, %v1162_v24, %v1496_v43 }
 0x238   : > { %v1249_v10 = vpop.permute.xlu0 %1248 }
 0x239   : > { %v1348_v57 = vmul.f32 %v1249_v10, %v2838_v38  ;;  %1376 = vst [vmem:[%s3013_s15 + $0x28] sm:$0xff] %v1344_v45 }
 0x23b   : > { %1380 = vst [vmem:[%s3013_s15 + $0x48] sm:$0xff] %v1348_v57 }
 0x23e   : > { %v1177_v2 = vpop.permute.xlu1 %1176  ;;  %v1245_v36 = vpop.permute.xlu2 %1244 }
 0x23f   : > { %v1347_v33 = vmul.f32 %v1245_v36, %v2825_v23  ;;  %v3051_v13 = vsel %vm954_vm6, %v1177_v2, %v1499_v26 }
 0x240   : > { %v1261_v44 = vpop.permute.xlu0 %1260 }
 0x241   : > { %v1351_v38 = vmul.f32 %v1261_v44, %v2862_v40  ;;  %1379 = vst [vmem:[%s3013_s15 + $0x40] sm:$0xff] %v1347_v33 }
 0x243   : > { %1383 = vst [vmem:[%s3013_s15 + $0x60] sm:$0xff] %v1351_v38 }
 0x246   : > { %v1257_v25 = vpop.permute.xlu2 %1256 }
 0x247   : > { %v1221_v32 = vpop.permute.xlu1 %1220  ;;  %v1350_v49 = vmul.f32 %v1257_v25, %v2851_v4 }
 0x248   : > { %v1341_v14 = vmul.f32 %v1221_v32, %v2858_v47  ;;  %v1273_v6 = vpop.permute.xlu0 %1272 }
 0x249   : > { %v1354_v23 = vmul.f32 %v1273_v6, %v2886_v27  ;;  %1382 = vst [vmem:[%s3013_s15 + $0x58] sm:$0xff] %v1350_v49 }
 0x24a   : > { %1373 = vst [vmem:[%s3013_s15 + $0x10] sm:$0xff] %v1341_v14 }
 0x24b   : > { %1386 = vst [vmem:[%s3013_s15 + $0x78] sm:$0xff] %v1354_v23 }
 0x24e   : > { %v1269_v35 = vpop.permute.xlu2 %1268 }
 0x24f   : > { %v1229_v40 = vpop.permute.xlu1 %1228  ;;  %v1353_v58 = vmul.f32 %v1269_v35, %v2875_v30 }
 0x250   : > { %v1343_v3 = vmul.f32 %v1229_v40, %v2882_v20  ;;  %v1285_v51 = vpop.permute.xlu0 %1284 }
 0x251   : > { %v1357_v4 = vmul.f32 %v1285_v51, %v2910_v59  ;;  %1385 = vst [vmem:[%s3013_s15 + $0x70] sm:$0xff] %v1353_v58 }
 0x252   : > { %1375 = vst [vmem:[%s3013_s15 + $0x20] sm:$0xff] %v1343_v3 }
 0x253   : > { %1389 = vst [vmem:[%s3013_s15 + $0x90] sm:$0xff] %v1357_v4 }
 0x256   : > { %v1281_v47 = vpop.permute.xlu2 %1280 }
 0x257   : > { %v1241_v27 = vpop.permute.xlu1 %1240  ;;  %v1356_v0 = vmul.f32 %v1281_v47, %v2899_v5 }
 0x258   : > { %v1346_v48 = vmul.f32 %v1241_v27, %v2906_v55  ;;  %v1297_v41 = vpop.permute.xlu0 %1296 }
 0x259   : > { %v1360_v30 = vmul.f32 %v1297_v41, %v2933_v62  ;;  %1388 = vst [vmem:[%s3013_s15 + $0x88] sm:$0xff] %v1356_v0 }
 0x25a   : > { %1378 = vst [vmem:[%s3013_s15 + $0x38] sm:$0xff] %v1346_v48 }
 0x25b   : > { %1392 = vst [vmem:[%s3013_s15 + $0xa8] sm:$0xff] %v1360_v30 }
 0x25e   : > { %v1293_v20 = vpop.permute.xlu2 %1292 }
 0x25f   : > { %v1253_v59 = vpop.permute.xlu1 %1252  ;;  %v1359_v22 = vmul.f32 %v1293_v20, %v2922_v15 }
 0x260   : > { %v1349_v34 = vmul.f32 %v1253_v59, %v2929_v12  ;;  %v1309_v18 = vpop.permute.xlu0 %1308 }
 0x261   : > { %v1363_v5 = vmul.f32 %v1309_v18, %v2956_v9  ;;  %1391 = vst [vmem:[%s3013_s15 + $0xa0] sm:$0xff] %v1359_v22 }
 0x262   : > { %1381 = vst [vmem:[%s3013_s15 + $0x50] sm:$0xff] %v1349_v34 }
 0x263   : > { %1395 = vst [vmem:[%s3013_s15 + $0xc0] sm:$0xff] %v1363_v5 }
 0x266   : > { %v1305_v55 = vpop.permute.xlu2 %1304 }
 0x267   : > { %v1265_v62 = vpop.permute.xlu1 %1264  ;;  %v1362_v61 = vmul.f32 %v1305_v55, %v2945_v31 }
 0x268   : > { %v1352_v54 = vmul.f32 %v1265_v62, %v2952_v7  ;;  %v1321_v63 = vpop.permute.xlu0 %1320 }
 0x269   : > { %v1366_v15 = vmul.f32 %v1321_v63, %v2979_v17  ;;  %1394 = vst [vmem:[%s3013_s15 + $0xb8] sm:$0xff] %v1362_v61 }
 0x26a   : > { %1384 = vst [vmem:[%s3013_s15 + $0x68] sm:$0xff] %v1352_v54 }
 0x26b   : > { %1398 = vst [vmem:[%s3013_s15 + $0xd8] sm:$0xff] %v1366_v15 }
 0x26e   : > { %v1317_v12 = vpop.permute.xlu2 %1316 }
 0x26f   : > { %v1277_v9 = vpop.permute.xlu1 %1276  ;;  %v1365_v11 = vmul.f32 %v1317_v12, %v2968_v16 }
 0x270   : > { %v1355_v56 = vmul.f32 %v1277_v9, %v2975_v21  ;;  %v1333_v52 = vpop.permute.xlu0 %1332 }
 0x271   : > { %v1369_v31 = vmul.f32 %v1333_v52, %v3002_v46  ;;  %1397 = vst [vmem:[%s3013_s15 + $0xd0] sm:$0xff] %v1365_v11 }
 0x272   : > { %1387 = vst [vmem:[%s3013_s15 + $0x80] sm:$0xff] %v1355_v56 }
 0x273   : > { %1401 = vst [vmem:[%s3013_s15 + $0xf0] sm:$0xff] %v1369_v31 }
 0x276   : > { %v1329_v7 = vpop.permute.xlu2 %1328 }
 0x277   : > { %v1289_v17 = vpop.permute.xlu1 %1288  ;;  %v1368_v53 = vmul.f32 %v1329_v7, %v2991_v19 }
 0x278   : > { %v1358_v1 = vmul.f32 %v1289_v17, %v2998_v29 }
 0x279   : > { %1400 = vst [vmem:[%s3013_s15 + $0xe8] sm:$0xff] %v1368_v53 }
 0x27a   : > { %1390 = vst [vmem:[%s3013_s15 + $0x98] sm:$0xff] %v1358_v1 }
 0x27f   : > { %v1301_v16 = vpop.permute.xlu1 %1300 }
 0x280   : > { %v1361_v21 = vmul.f32 %v1301_v16, %v3018_v42 }
 0x282   : > { %1393 = vst [vmem:[%s3013_s15 + $0xb0] sm:$0xff] %v1361_v21 }
 0x287   : > { %v1313_v8 = vpop.permute.xlu1 %1312 }
 0x288   : > { %v1364_v46 = vmul.f32 %v1313_v8, %v3029_v50 }
 0x28a   : > { %1396 = vst [vmem:[%s3013_s15 + $0xc8] sm:$0xff] %v1364_v46 }
 0x28f   : > { %v1325_v28 = vpop.permute.xlu1 %1324 }
 0x290   : > { %v1367_v60 = vmul.f32 %v1325_v28, %v3040_v39 }
 0x292   : > { %1399 = vst [vmem:[%s3013_s15 + $0xe0] sm:$0xff] %v1367_v60 }
 0x297   : > { %v1337_v43 = vpop.permute.xlu1 %1336 }
 0x298   : > { %v1370_v24 = vmul.f32 %v1337_v43, %v3051_v13 }
 0x29a   : > { %1402 = vst [vmem:[%s3013_s15 + $0xf8] sm:$0xff] %v1370_v24 }
 0x29b PF: > { %s11_s6 = sadd.s32 1, %s1733_s6  }
 0x29c   : > { %p8_p4 = scmp.ge.s32.totalorder %s11_s6, 4  }
 0x29e   :  { %10 = sbr.rel (!%p8_p4) target bundleno = 1 (0x1), region = 54 }

</bundles_post_ra>
